<compile_context>
chip_gen: v7x
topology: tpu7x:2x2x1
jax: 0.10.0
libtpu: 0.0.40
codegen_flags: <defaults>
</compile_context>

<pallas_src>
import functools

import jax
import jax.numpy as jnp
from jax import lax
from jax.experimental import pallas as pl
from jax.experimental.pallas import tpu as pltpu

LN_EPS = 1e-5  # PyTorch nn.LayerNorm default


def tree_lstm_kernel(h0_ref, h1_ref, c0_ref, c1_ref, w_ref, gamma_ref, beta_ref,
                     hc_out_ref, *scratch, single_k256_dot):
    H = c0_ref.shape[-1]
    inv_h = 1.0 / H

    if single_k256_dot:
        # v6e/v7x (256-wide MXU): stage h0|h1 into one (block_b, 2H) bf16 slab
        # (two lane-aligned stores) and issue a single K=2H dot.
        stage_ref, = scratch
        stage_ref[:, :H] = h0_ref[...].astype(jnp.bfloat16)
        stage_ref[:, H:] = h1_ref[...].astype(jnp.bfloat16)
        y = jnp.dot(stage_ref[...], w_ref[...], preferred_element_type=jnp.float32)
    else:
        # v5e (128x128 MXU): two accumulating K=H dots, no staging copy.
        y = jnp.dot(h0_ref[...].astype(jnp.bfloat16), w_ref[:H, :],
                    preferred_element_type=jnp.float32)
        y = y + jnp.dot(h1_ref[...].astype(jnp.bfloat16), w_ref[H:, :],
                        preferred_element_type=jnp.float32)

    def layer_norm(x, ln_idx):
        # x: (block_b, H) f32.  One-pass: reduce sum(x) and sum(x*x) together,
        # var = E[x^2] - mean^2 (biased variance + eps, like nn.LayerNorm).
        s1 = jnp.sum(x, axis=-1, keepdims=True)
        s2 = jnp.sum(x * x, axis=-1, keepdims=True)
        mu = s1 * inv_h
        var = s2 * inv_h - mu * mu
        g = gamma_ref[ln_idx:ln_idx + 1, :]
        b = beta_ref[ln_idx:ln_idx + 1, :]
        return (x - mu) * lax.rsqrt(var + LN_EPS) * g + b

    def gate(k):
        # Lane-offset slice of y (offsets are multiples of 128) -> no relayout.
        return layer_norm(y[:, k * H:(k + 1) * H], k)

    f0 = jax.nn.sigmoid(gate(0))
    f1 = jax.nn.sigmoid(gate(1))
    i_g = jax.nn.sigmoid(gate(2))
    o_g = jax.nn.sigmoid(gate(3))
    # TODO(synk): dropout on u is identity here (eval mode / dropout=None).
    u = jnp.tanh(gate(4))

    c0 = c0_ref[...].astype(jnp.float32)
    c1 = c1_ref[...].astype(jnp.float32)
    pre_cell = i_g * u + f0 * c0 + f1 * c1
    c_new = layer_norm(pre_cell, 5)
    h_new = o_g * jnp.tanh(c_new)

    # Packed lane-dense (block_b, 2H) writeback: [h_new | c_new].
    hc_out_ref[:, :H] = h_new.astype(hc_out_ref.dtype)
    hc_out_ref[:, H:] = c_new.astype(hc_out_ref.dtype)


def _round_up(x, m):
    return -(-x // m) * m


@functools.partial(jax.jit,
                   static_argnames=("block_b", "single_k256_dot", "out_dtype"))
def tree_lstm_cell_batched(h0, c0, h1, c1, w_t_bf16, ln_gamma, ln_beta, *,
                           block_b=256, single_k256_dot=True, out_dtype=None):
    """Batched forward over B tree nodes.

    h0, c0, h1, c1: (B, H) float32 or bfloat16 (gate math is always f32)
    w_t_bf16:       (2H, 5H) bfloat16  (transposed Linear weight, no bias)
    ln_gamma/beta:  (6, H) float32, rows = [f0, f1, i, o, u, cell]
    block_b:        row-tile size; sweep 128/256/512 (cap ~128-256 on v5e)
    single_k256_dot: True on v6e/v7x (256-wide MXU); False on v5e (128x128 MXU)
    returns (h_new, c_new), each (B, H) in out_dtype (defaults to h0.dtype)
    """
    B, H = h0.shape
    out_dtype = h0.dtype if out_dtype is None else out_dtype

    # Cap the row tile so the grid has >= 2 steps (v7x: both TensorCores do work
    # under dimension_semantics=("parallel",)), and keep it a multiple of 8.
    # No host-side jnp.pad: the grid uses cdiv and Pallas masks the partial
    # boundary block (rows are independent, OOB writes are masked).
    eff_block = max(8, min(block_b, _round_up(pl.cdiv(B, 2), 8)))
    grid = (pl.cdiv(B, eff_block),)

    row_spec = pl.BlockSpec((eff_block, H), lambda i: (i, 0))

    def const_spec(shape):
        # Constant index_map + single buffer: one resident VMEM copy, no
        # double-buffering cost for data that never changes across grid steps.
        return pl.BlockSpec(shape, lambda i: (0, 0), pipeline_mode=pl.Buffered(1))

    scratch_shapes = []
    if single_k256_dot:
        scratch_shapes.append(pltpu.VMEM((eff_block, 2 * H), jnp.bfloat16))

    hc = pl.pallas_call(
        functools.partial(tree_lstm_kernel, single_k256_dot=single_k256_dot),
        out_shape=jax.ShapeDtypeStruct((B, 2 * H), out_dtype),
        grid_spec=pltpu.PrefetchScalarGridSpec(
            num_scalar_prefetch=0,
            grid=grid,
            in_specs=[
                row_spec, row_spec, row_spec, row_spec,   # h0, h1, c0, c1
                const_spec((2 * H, 5 * H)),               # W: VMEM-resident
                const_spec((6, H)),                       # LN gammas
                const_spec((6, H)),                       # LN betas
            ],
            out_specs=pl.BlockSpec((eff_block, 2 * H), lambda i: (i, 0)),
            scratch_shapes=scratch_shapes,
        ),
        compiler_params=pltpu.CompilerParams(
            # Batch axis is independent -> shard across TensorCores on v7x.
            dimension_semantics=("parallel",),
            # NOTE: for very large H, also tile W over the 5H axis (gate grid
            # axis) and/or raise vmem_limit_bytes; unnecessary at H=128.
        ),
    )(h0, h1, c0, c1, w_t_bf16, ln_gamma, ln_beta)
    return hc[:, :H], hc[:, H:]


def tree_lstm_cell(state0, state1, w_t_bf16, ln_gamma, ln_beta, **kw):
    """Single-node interface mirroring the module's forward((h0,c0),(h1,c1)).

    TODO(synk): in a real tree traversal, batch all nodes of a tree level into
    one tree_lstm_cell_batched call; a per-node launch is pure overhead.
    """
    h0, c0 = state0
    h1, c1 = state1
    H = h0.shape[0]
    # Pad the single row to a full (8, H) sublane tile (7 zero rows, negligible).
    pad8 = lambda x: jnp.pad(x.reshape(1, H), ((0, 7), (0, 0)))
    h_new, c_new = tree_lstm_cell_batched(
        pad8(h0), pad8(c0), pad8(h1), pad8(c1),
        w_t_bf16, ln_gamma, ln_beta, block_b=8, **kw)
    return h_new[0], c_new[0]


def _reference(h0, c0, h1, c1, w_t_bf16, ln_gamma, ln_beta):
    """Pure-JAX reference mirroring the PyTorch forward (same bf16 MXU matmul)."""
    H = h0.shape[-1]
    hcat = jnp.concatenate([h0, h1], axis=-1).astype(jnp.bfloat16)
    y = jnp.dot(hcat, w_t_bf16, preferred_element_type=jnp.float32)

    def ln(x, k):
        mu = jnp.mean(x, axis=-1, keepdims=True)
        var = jnp.mean(jnp.square(x - mu), axis=-1, keepdims=True)
        return (x - mu) / jnp.sqrt(var + LN_EPS) * ln_gamma[k] + ln_beta[k]

    f0 = jax.nn.sigmoid(ln(y[:, 0 * H:1 * H], 0))
    f1 = jax.nn.sigmoid(ln(y[:, 1 * H:2 * H], 1))
    i_g = jax.nn.sigmoid(ln(y[:, 2 * H:3 * H], 2))
    o_g = jax.nn.sigmoid(ln(y[:, 3 * H:4 * H], 3))
    u = jnp.tanh(ln(y[:, 4 * H:5 * H], 4))
    c_new = ln(i_g * u + f0 * c0 + f1 * c1, 5)
    h_new = o_g * jnp.tanh(c_new)
    return h_new, c_new


if __name__ == "__main__":
    H = 128   # hidden_size (lane-aligned)
    B = 64    # number of tree nodes batched into one pallas_call

    key = jax.random.PRNGKey(0)
    k_w, k_h0, k_c0, k_h1, k_c1, k_g, k_b = jax.random.split(key, 7)

    # Parameters matching the PyTorch module: ffiou_linear.weight (5H, 2H), no bias.
    bound = 1.0 / jnp.sqrt(2.0 * H)
    w = jax.random.uniform(k_w, (5 * H, 2 * H), jnp.float32, -bound, bound)
    w_t_bf16 = w.T.astype(jnp.bfloat16)  # (2H, 5H); bf16 halves HBM weight traffic

    # 6 LayerNorms (f0, f1, i, o, u, cell): gamma ~ 1 + noise, beta ~ noise.
    ln_gamma = 1.0 + 0.1 * jax.random.normal(k_g, (6, H), jnp.float32)
    ln_beta = 0.1 * jax.random.normal(k_b, (6, H), jnp.float32)

    # Batched node states.
    h0 = jax.random.normal(k_h0, (B, H), jnp.float32)
    c0 = jax.random.normal(k_c0, (B, H), jnp.float32)
    h1 = jax.random.normal(k_h1, (B, H), jnp.float32)
    c1 = jax.random.normal(k_c1, (B, H), jnp.float32)

    # v5e (128x128 MXU, 1 vst slot): keep two K=128 dots, cap block_b ~128-256.
    kind = jax.devices()[0].device_kind.lower()
    use_k256 = not ("v5 lite" in kind or "v5e" in kind)

    h_new, c_new = tree_lstm_cell_batched(h0, c0, h1, c1, w_t_bf16,
                                          ln_gamma, ln_beta,
                                          block_b=256, single_k256_dot=use_k256)
    jax.block_until_ready((h_new, c_new))

    h_ref, c_ref = _reference(h0, c0, h1, c1, w_t_bf16, ln_gamma, ln_beta)
    assert jnp.allclose(h_new, h_ref, atol=5e-3, rtol=5e-3), "h mismatch"
    assert jnp.allclose(c_new, c_ref, atol=5e-3, rtol=5e-3), "c mismatch"

    # Single-node interface (same semantics as the module's forward).
    hs, cs = tree_lstm_cell((h0[0], c0[0]), (h1[0], c1[0]),
                            w_t_bf16, ln_gamma, ln_beta,
                            single_k256_dot=use_k256)
    jax.block_until_ready((hs, cs))
    assert jnp.allclose(hs, h_ref[0], atol=5e-3, rtol=5e-3), "single-node h mismatch"
    assert jnp.allclose(cs, c_ref[0], atol=5e-3, rtol=5e-3), "single-node c mismatch"

    print("KERNEL_OK")
</pallas_src>

<mosaic_0001>
module attributes {stable_mosaic.version = 11 : i64} {
  func.func @tree_lstm_kernel(%arg0: i32, %arg1: memref<32x128xf32, #tpu.memory_space<vmem>>, %arg2: memref<32x128xf32, #tpu.memory_space<vmem>>, %arg3: memref<32x128xf32, #tpu.memory_space<vmem>>, %arg4: memref<32x128xf32, #tpu.memory_space<vmem>>, %arg5: memref<256x640xbf16, #tpu.memory_space<vmem>>, %arg6: memref<6x128xf32, #tpu.memory_space<vmem>>, %arg7: memref<6x128xf32, #tpu.memory_space<vmem>>, %arg8: memref<32x256xf32, #tpu.memory_space<vmem>>, %arg9: memref<32x256xbf16, #tpu.memory_space<vmem>>) attributes {dimension_semantics = [#tpu.dimension_semantics<parallel>], iteration_bounds = array<i64: 2>, scalar_prefetch = 0 : i64, scratch_operands = 1 : i64, tpu.core_type = #tpu.core_type<tc>, window_params = [{transform_indices = @transform_0, window_bounds = array<i64: 32, 128>}, {transform_indices = @transform_1, window_bounds = array<i64: 32, 128>}, {transform_indices = @transform_2, window_bounds = array<i64: 32, 128>}, {transform_indices = @transform_3, window_bounds = array<i64: 32, 128>}, {pipeline_mode = #tpu.pipeline_mode<synchronous>, transform_indices = @transform_4, window_bounds = array<i64: 256, 640>}, {pipeline_mode = #tpu.pipeline_mode<synchronous>, transform_indices = @transform_5, window_bounds = array<i64: 6, 128>}, {pipeline_mode = #tpu.pipeline_mode<synchronous>, transform_indices = @transform_6, window_bounds = array<i64: 6, 128>}, {transform_indices = @transform_7, window_bounds = array<i64: 32, 256>}]} {
    %c0 = arith.constant 0 : index
    %c0_0 = arith.constant 0 : index
    %0 = vector.load %arg1[%c0, %c0_0] : memref<32x128xf32, #tpu.memory_space<vmem>>, vector<32x128xf32>
    %1 = arith.truncf %0 : vector<32x128xf32> to vector<32x128xbf16>
    %c0_1 = arith.constant 0 : index
    %c0_2 = arith.constant 0 : index
    %2 = vector.load %arg9[%c0_1, %c0_2] : memref<32x256xbf16, #tpu.memory_space<vmem>>, vector<32x128xbf16>
    tpu.vector_store %arg9[%c0_1, %c0_2], %1 {strides = array<i32>} : memref<32x256xbf16, #tpu.memory_space<vmem>>, vector<32x128xbf16>,
    %c0_3 = arith.constant 0 : index
    %c0_4 = arith.constant 0 : index
    %3 = vector.load %arg2[%c0_3, %c0_4] : memref<32x128xf32, #tpu.memory_space<vmem>>, vector<32x128xf32>
    %4 = arith.truncf %3 : vector<32x128xf32> to vector<32x128xbf16>
    %c0_5 = arith.constant 0 : index
    %c128 = arith.constant 128 : index
    %5 = vector.load %arg9[%c0_5, %c128] : memref<32x256xbf16, #tpu.memory_space<vmem>>, vector<32x128xbf16>
    tpu.vector_store %arg9[%c0_5, %c128], %4 {strides = array<i32>} : memref<32x256xbf16, #tpu.memory_space<vmem>>, vector<32x128xbf16>,
    %c0_6 = arith.constant 0 : index
    %c0_7 = arith.constant 0 : index
    %6 = vector.load %arg9[%c0_6, %c0_7] : memref<32x256xbf16, #tpu.memory_space<vmem>>, vector<32x256xbf16>
    %c0_8 = arith.constant 0 : index
    %c0_9 = arith.constant 0 : index
    %7 = vector.load %arg5[%c0_8, %c0_9] : memref<256x640xbf16, #tpu.memory_space<vmem>>, vector<256x640xbf16>
    %cst = arith.constant dense<0.000000e+00> : vector<32x640xf32>
    %8 = tpu.matmul %6, %7, %cst {dimension_numbers = #tpu.dot_dimension_numbers<[1], [0], [0], [1], [0, 0, 1, 1], [], []>} : vector<32x256xbf16>, vector<256x640xbf16>, vector<32x640xf32> -> vector<32x640xf32>
    %9 = vector.extract_strided_slice %8 {offsets = [0, 0], sizes = [32, 128], strides = [1, 1]} : vector<32x640xf32> to vector<32x128xf32>
    %cst_10 = arith.constant dense<0.000000e+00> : vector<32xf32>
    %10 = vector.multi_reduction <add>, %9, %cst_10 [1] : vector<32x128xf32> to vector<32xf32>
    %11 = vector.shape_cast %10 : vector<32xf32> to vector<32x1xf32>
    %12 = arith.mulf %9, %9 : vector<32x128xf32>
    %cst_11 = arith.constant dense<0.000000e+00> : vector<32xf32>
    %13 = vector.multi_reduction <add>, %12, %cst_11 [1] : vector<32x128xf32> to vector<32xf32>
    %14 = vector.shape_cast %13 : vector<32xf32> to vector<32x1xf32>
    %cst_12 = arith.constant 7.812500e-03 : f32
    %15 = vector.broadcast %cst_12 : f32 to vector<32x1xf32>
    %16 = arith.mulf %11, %15 : vector<32x1xf32>
    %cst_13 = arith.constant 7.812500e-03 : f32
    %17 = vector.broadcast %cst_13 : f32 to vector<32x1xf32>
    %18 = arith.mulf %14, %17 : vector<32x1xf32>
    %19 = arith.mulf %16, %16 : vector<32x1xf32>
    %20 = arith.subf %18, %19 : vector<32x1xf32>
    %c0_14 = arith.constant 0 : index
    %c0_15 = arith.constant 0 : index
    %21 = vector.load %arg6[%c0_14, %c0_15] : memref<6x128xf32, #tpu.memory_space<vmem>>, vector<1x128xf32>
    %c0_16 = arith.constant 0 : index
    %c0_17 = arith.constant 0 : index
    %22 = vector.load %arg7[%c0_16, %c0_17] : memref<6x128xf32, #tpu.memory_space<vmem>>, vector<1x128xf32>
    %23 = vector.broadcast %16 : vector<32x1xf32> to vector<32x128xf32>
    %24 = arith.subf %9, %23 : vector<32x128xf32>
    %cst_18 = arith.constant 9.99999974E-6 : f32
    %25 = vector.broadcast %cst_18 : f32 to vector<32x1xf32>
    %26 = arith.addf %20, %25 : vector<32x1xf32>
    %27 = math.rsqrt %26 : vector<32x1xf32>
    %28 = vector.broadcast %27 : vector<32x1xf32> to vector<32x128xf32>
    %29 = arith.mulf %24, %28 : vector<32x128xf32>
    %30 = vector.broadcast %21 : vector<1x128xf32> to vector<32x128xf32>
    %31 = arith.mulf %29, %30 : vector<32x128xf32>
    %32 = vector.broadcast %22 : vector<1x128xf32> to vector<32x128xf32>
    %33 = arith.addf %31, %32 : vector<32x128xf32>
    %34 = arith.negf %33 : vector<32x128xf32>
    %35 = math.exp %34 : vector<32x128xf32>
    %cst_19 = arith.constant 1.000000e+00 : f32
    %36 = vector.broadcast %cst_19 : f32 to vector<32x128xf32>
    %37 = arith.addf %36, %35 : vector<32x128xf32>
    %38 = arith.divf %36, %37 : vector<32x128xf32>
    %39 = vector.extract_strided_slice %8 {offsets = [0, 128], sizes = [32, 128], strides = [1, 1]} : vector<32x640xf32> to vector<32x128xf32>
    %cst_20 = arith.constant dense<0.000000e+00> : vector<32xf32>
    %40 = vector.multi_reduction <add>, %39, %cst_20 [1] : vector<32x128xf32> to vector<32xf32>
    %41 = vector.shape_cast %40 : vector<32xf32> to vector<32x1xf32>
    %42 = arith.mulf %39, %39 : vector<32x128xf32>
    %cst_21 = arith.constant dense<0.000000e+00> : vector<32xf32>
    %43 = vector.multi_reduction <add>, %42, %cst_21 [1] : vector<32x128xf32> to vector<32xf32>
    %44 = vector.shape_cast %43 : vector<32xf32> to vector<32x1xf32>
    %cst_22 = arith.constant 7.812500e-03 : f32
    %45 = vector.broadcast %cst_22 : f32 to vector<32x1xf32>
    %46 = arith.mulf %41, %45 : vector<32x1xf32>
    %cst_23 = arith.constant 7.812500e-03 : f32
    %47 = vector.broadcast %cst_23 : f32 to vector<32x1xf32>
    %48 = arith.mulf %44, %47 : vector<32x1xf32>
    %49 = arith.mulf %46, %46 : vector<32x1xf32>
    %50 = arith.subf %48, %49 : vector<32x1xf32>
    %c1 = arith.constant 1 : index
    %c0_24 = arith.constant 0 : index
    %51 = vector.load %arg6[%c1, %c0_24] : memref<6x128xf32, #tpu.memory_space<vmem>>, vector<1x128xf32>
    %c1_25 = arith.constant 1 : index
    %c0_26 = arith.constant 0 : index
    %52 = vector.load %arg7[%c1_25, %c0_26] : memref<6x128xf32, #tpu.memory_space<vmem>>, vector<1x128xf32>
    %53 = vector.broadcast %46 : vector<32x1xf32> to vector<32x128xf32>
    %54 = arith.subf %39, %53 : vector<32x128xf32>
    %cst_27 = arith.constant 9.99999974E-6 : f32
    %55 = vector.broadcast %cst_27 : f32 to vector<32x1xf32>
    %56 = arith.addf %50, %55 : vector<32x1xf32>
    %57 = math.rsqrt %56 : vector<32x1xf32>
    %58 = vector.broadcast %57 : vector<32x1xf32> to vector<32x128xf32>
    %59 = arith.mulf %54, %58 : vector<32x128xf32>
    %60 = vector.broadcast %51 : vector<1x128xf32> to vector<32x128xf32>
    %61 = arith.mulf %59, %60 : vector<32x128xf32>
    %62 = vector.broadcast %52 : vector<1x128xf32> to vector<32x128xf32>
    %63 = arith.addf %61, %62 : vector<32x128xf32>
    %64 = arith.negf %63 : vector<32x128xf32>
    %65 = math.exp %64 : vector<32x128xf32>
    %cst_28 = arith.constant 1.000000e+00 : f32
    %66 = vector.broadcast %cst_28 : f32 to vector<32x128xf32>
    %67 = arith.addf %66, %65 : vector<32x128xf32>
    %68 = arith.divf %66, %67 : vector<32x128xf32>
    %69 = vector.extract_strided_slice %8 {offsets = [0, 256], sizes = [32, 128], strides = [1, 1]} : vector<32x640xf32> to vector<32x128xf32>
    %cst_29 = arith.constant dense<0.000000e+00> : vector<32xf32>
    %70 = vector.multi_reduction <add>, %69, %cst_29 [1] : vector<32x128xf32> to vector<32xf32>
    %71 = vector.shape_cast %70 : vector<32xf32> to vector<32x1xf32>
    %72 = arith.mulf %69, %69 : vector<32x128xf32>
    %cst_30 = arith.constant dense<0.000000e+00> : vector<32xf32>
    %73 = vector.multi_reduction <add>, %72, %cst_30 [1] : vector<32x128xf32> to vector<32xf32>
    %74 = vector.shape_cast %73 : vector<32xf32> to vector<32x1xf32>
    %cst_31 = arith.constant 7.812500e-03 : f32
    %75 = vector.broadcast %cst_31 : f32 to vector<32x1xf32>
    %76 = arith.mulf %71, %75 : vector<32x1xf32>
    %cst_32 = arith.constant 7.812500e-03 : f32
    %77 = vector.broadcast %cst_32 : f32 to vector<32x1xf32>
    %78 = arith.mulf %74, %77 : vector<32x1xf32>
    %79 = arith.mulf %76, %76 : vector<32x1xf32>
    %80 = arith.subf %78, %79 : vector<32x1xf32>
    %c2 = arith.constant 2 : index
    %c0_33 = arith.constant 0 : index
    %81 = vector.load %arg6[%c2, %c0_33] : memref<6x128xf32, #tpu.memory_space<vmem>>, vector<1x128xf32>
    %c2_34 = arith.constant 2 : index
    %c0_35 = arith.constant 0 : index
    %82 = vector.load %arg7[%c2_34, %c0_35] : memref<6x128xf32, #tpu.memory_space<vmem>>, vector<1x128xf32>
    %83 = vector.broadcast %76 : vector<32x1xf32> to vector<32x128xf32>
    %84 = arith.subf %69, %83 : vector<32x128xf32>
    %cst_36 = arith.constant 9.99999974E-6 : f32
    %85 = vector.broadcast %cst_36 : f32 to vector<32x1xf32>
    %86 = arith.addf %80, %85 : vector<32x1xf32>
    %87 = math.rsqrt %86 : vector<32x1xf32>
    %88 = vector.broadcast %87 : vector<32x1xf32> to vector<32x128xf32>
    %89 = arith.mulf %84, %88 : vector<32x128xf32>
    %90 = vector.broadcast %81 : vector<1x128xf32> to vector<32x128xf32>
    %91 = arith.mulf %89, %90 : vector<32x128xf32>
    %92 = vector.broadcast %82 : vector<1x128xf32> to vector<32x128xf32>
    %93 = arith.addf %91, %92 : vector<32x128xf32>
    %94 = arith.negf %93 : vector<32x128xf32>
    %95 = math.exp %94 : vector<32x128xf32>
    %cst_37 = arith.constant 1.000000e+00 : f32
    %96 = vector.broadcast %cst_37 : f32 to vector<32x128xf32>
    %97 = arith.addf %96, %95 : vector<32x128xf32>
    %98 = arith.divf %96, %97 : vector<32x128xf32>
    %99 = vector.extract_strided_slice %8 {offsets = [0, 384], sizes = [32, 128], strides = [1, 1]} : vector<32x640xf32> to vector<32x128xf32>
    %cst_38 = arith.constant dense<0.000000e+00> : vector<32xf32>
    %100 = vector.multi_reduction <add>, %99, %cst_38 [1] : vector<32x128xf32> to vector<32xf32>
    %101 = vector.shape_cast %100 : vector<32xf32> to vector<32x1xf32>
    %102 = arith.mulf %99, %99 : vector<32x128xf32>
    %cst_39 = arith.constant dense<0.000000e+00> : vector<32xf32>
    %103 = vector.multi_reduction <add>, %102, %cst_39 [1] : vector<32x128xf32> to vector<32xf32>
    %104 = vector.shape_cast %103 : vector<32xf32> to vector<32x1xf32>
    %cst_40 = arith.constant 7.812500e-03 : f32
    %105 = vector.broadcast %cst_40 : f32 to vector<32x1xf32>
    %106 = arith.mulf %101, %105 : vector<32x1xf32>
    %cst_41 = arith.constant 7.812500e-03 : f32
    %107 = vector.broadcast %cst_41 : f32 to vector<32x1xf32>
    %108 = arith.mulf %104, %107 : vector<32x1xf32>
    %109 = arith.mulf %106, %106 : vector<32x1xf32>
    %110 = arith.subf %108, %109 : vector<32x1xf32>
    %c3 = arith.constant 3 : index
    %c0_42 = arith.constant 0 : index
    %111 = vector.load %arg6[%c3, %c0_42] : memref<6x128xf32, #tpu.memory_space<vmem>>, vector<1x128xf32>
    %c3_43 = arith.constant 3 : index
    %c0_44 = arith.constant 0 : index
    %112 = vector.load %arg7[%c3_43, %c0_44] : memref<6x128xf32, #tpu.memory_space<vmem>>, vector<1x128xf32>
    %113 = vector.broadcast %106 : vector<32x1xf32> to vector<32x128xf32>
    %114 = arith.subf %99, %113 : vector<32x128xf32>
    %cst_45 = arith.constant 9.99999974E-6 : f32
    %115 = vector.broadcast %cst_45 : f32 to vector<32x1xf32>
    %116 = arith.addf %110, %115 : vector<32x1xf32>
    %117 = math.rsqrt %116 : vector<32x1xf32>
    %118 = vector.broadcast %117 : vector<32x1xf32> to vector<32x128xf32>
    %119 = arith.mulf %114, %118 : vector<32x128xf32>
    %120 = vector.broadcast %111 : vector<1x128xf32> to vector<32x128xf32>
    %121 = arith.mulf %119, %120 : vector<32x128xf32>
    %122 = vector.broadcast %112 : vector<1x128xf32> to vector<32x128xf32>
    %123 = arith.addf %121, %122 : vector<32x128xf32>
    %124 = arith.negf %123 : vector<32x128xf32>
    %125 = math.exp %124 : vector<32x128xf32>
    %cst_46 = arith.constant 1.000000e+00 : f32
    %126 = vector.broadcast %cst_46 : f32 to vector<32x128xf32>
    %127 = arith.addf %126, %125 : vector<32x128xf32>
    %128 = arith.divf %126, %127 : vector<32x128xf32>
    %129 = vector.extract_strided_slice %8 {offsets = [0, 512], sizes = [32, 128], strides = [1, 1]} : vector<32x640xf32> to vector<32x128xf32>
    %cst_47 = arith.constant dense<0.000000e+00> : vector<32xf32>
    %130 = vector.multi_reduction <add>, %129, %cst_47 [1] : vector<32x128xf32> to vector<32xf32>
    %131 = vector.shape_cast %130 : vector<32xf32> to vector<32x1xf32>
    %132 = arith.mulf %129, %129 : vector<32x128xf32>
    %cst_48 = arith.constant dense<0.000000e+00> : vector<32xf32>
    %133 = vector.multi_reduction <add>, %132, %cst_48 [1] : vector<32x128xf32> to vector<32xf32>
    %134 = vector.shape_cast %133 : vector<32xf32> to vector<32x1xf32>
    %cst_49 = arith.constant 7.812500e-03 : f32
    %135 = vector.broadcast %cst_49 : f32 to vector<32x1xf32>
    %136 = arith.mulf %131, %135 : vector<32x1xf32>
    %cst_50 = arith.constant 7.812500e-03 : f32
    %137 = vector.broadcast %cst_50 : f32 to vector<32x1xf32>
    %138 = arith.mulf %134, %137 : vector<32x1xf32>
    %139 = arith.mulf %136, %136 : vector<32x1xf32>
    %140 = arith.subf %138, %139 : vector<32x1xf32>
    %c4 = arith.constant 4 : index
    %c0_51 = arith.constant 0 : index
    %141 = vector.load %arg6[%c4, %c0_51] : memref<6x128xf32, #tpu.memory_space<vmem>>, vector<1x128xf32>
    %c4_52 = arith.constant 4 : index
    %c0_53 = arith.constant 0 : index
    %142 = vector.load %arg7[%c4_52, %c0_53] : memref<6x128xf32, #tpu.memory_space<vmem>>, vector<1x128xf32>
    %143 = vector.broadcast %136 : vector<32x1xf32> to vector<32x128xf32>
    %144 = arith.subf %129, %143 : vector<32x128xf32>
    %cst_54 = arith.constant 9.99999974E-6 : f32
    %145 = vector.broadcast %cst_54 : f32 to vector<32x1xf32>
    %146 = arith.addf %140, %145 : vector<32x1xf32>
    %147 = math.rsqrt %146 : vector<32x1xf32>
    %148 = vector.broadcast %147 : vector<32x1xf32> to vector<32x128xf32>
    %149 = arith.mulf %144, %148 : vector<32x128xf32>
    %150 = vector.broadcast %141 : vector<1x128xf32> to vector<32x128xf32>
    %151 = arith.mulf %149, %150 : vector<32x128xf32>
    %152 = vector.broadcast %142 : vector<1x128xf32> to vector<32x128xf32>
    %153 = arith.addf %151, %152 : vector<32x128xf32>
    %154 = math.tanh %153 : vector<32x128xf32>
    %c0_55 = arith.constant 0 : index
    %c0_56 = arith.constant 0 : index
    %155 = vector.load %arg3[%c0_55, %c0_56] : memref<32x128xf32, #tpu.memory_space<vmem>>, vector<32x128xf32>
    %c0_57 = arith.constant 0 : index
    %c0_58 = arith.constant 0 : index
    %156 = vector.load %arg4[%c0_57, %c0_58] : memref<32x128xf32, #tpu.memory_space<vmem>>, vector<32x128xf32>
    %157 = arith.mulf %98, %154 : vector<32x128xf32>
    %158 = arith.mulf %38, %155 : vector<32x128xf32>
    %159 = arith.addf %157, %158 : vector<32x128xf32>
    %160 = arith.mulf %68, %156 : vector<32x128xf32>
    %161 = arith.addf %159, %160 : vector<32x128xf32>
    %cst_59 = arith.constant dense<0.000000e+00> : vector<32xf32>
    %162 = vector.multi_reduction <add>, %161, %cst_59 [1] : vector<32x128xf32> to vector<32xf32>
    %163 = vector.shape_cast %162 : vector<32xf32> to vector<32x1xf32>
    %164 = arith.mulf %161, %161 : vector<32x128xf32>
    %cst_60 = arith.constant dense<0.000000e+00> : vector<32xf32>
    %165 = vector.multi_reduction <add>, %164, %cst_60 [1] : vector<32x128xf32> to vector<32xf32>
    %166 = vector.shape_cast %165 : vector<32xf32> to vector<32x1xf32>
    %cst_61 = arith.constant 7.812500e-03 : f32
    %167 = vector.broadcast %cst_61 : f32 to vector<32x1xf32>
    %168 = arith.mulf %163, %167 : vector<32x1xf32>
    %cst_62 = arith.constant 7.812500e-03 : f32
    %169 = vector.broadcast %cst_62 : f32 to vector<32x1xf32>
    %170 = arith.mulf %166, %169 : vector<32x1xf32>
    %171 = arith.mulf %168, %168 : vector<32x1xf32>
    %172 = arith.subf %170, %171 : vector<32x1xf32>
    %c5 = arith.constant 5 : index
    %c0_63 = arith.constant 0 : index
    %173 = vector.load %arg6[%c5, %c0_63] : memref<6x128xf32, #tpu.memory_space<vmem>>, vector<1x128xf32>
    %c5_64 = arith.constant 5 : index
    %c0_65 = arith.constant 0 : index
    %174 = vector.load %arg7[%c5_64, %c0_65] : memref<6x128xf32, #tpu.memory_space<vmem>>, vector<1x128xf32>
    %175 = vector.broadcast %168 : vector<32x1xf32> to vector<32x128xf32>
    %176 = arith.subf %161, %175 : vector<32x128xf32>
    %cst_66 = arith.constant 9.99999974E-6 : f32
    %177 = vector.broadcast %cst_66 : f32 to vector<32x1xf32>
    %178 = arith.addf %172, %177 : vector<32x1xf32>
    %179 = math.rsqrt %178 : vector<32x1xf32>
    %180 = vector.broadcast %179 : vector<32x1xf32> to vector<32x128xf32>
    %181 = arith.mulf %176, %180 : vector<32x128xf32>
    %182 = vector.broadcast %173 : vector<1x128xf32> to vector<32x128xf32>
    %183 = arith.mulf %181, %182 : vector<32x128xf32>
    %184 = vector.broadcast %174 : vector<1x128xf32> to vector<32x128xf32>
    %185 = arith.addf %183, %184 : vector<32x128xf32>
    %186 = math.tanh %185 : vector<32x128xf32>
    %187 = arith.mulf %128, %186 : vector<32x128xf32>
    %c0_67 = arith.constant 0 : index
    %c0_68 = arith.constant 0 : index
    %188 = vector.load %arg8[%c0_67, %c0_68] : memref<32x256xf32, #tpu.memory_space<vmem>>, vector<32x128xf32>
    tpu.vector_store %arg8[%c0_67, %c0_68], %187 {strides = array<i32>} : memref<32x256xf32, #tpu.memory_space<vmem>>, vector<32x128xf32>,
    %c0_69 = arith.constant 0 : index
    %c128_70 = arith.constant 128 : index
    %189 = vector.load %arg8[%c0_69, %c128_70] : memref<32x256xf32, #tpu.memory_space<vmem>>, vector<32x128xf32>
    tpu.vector_store %arg8[%c0_69, %c128_70], %185 {strides = array<i32>} : memref<32x256xf32, #tpu.memory_space<vmem>>, vector<32x128xf32>,
    return
  }
  func.func @transform_0(%arg0: i32) -> (i32, i32) {
    %c0_i32 = arith.constant 0 : i32
    %c0_i32_0 = arith.constant 0 : i32
    return %arg0, %c0_i32 : i32, i32
  }
  func.func @transform_1(%arg0: i32) -> (i32, i32) {
    %c0_i32 = arith.constant 0 : i32
    %c0_i32_0 = arith.constant 0 : i32
    return %arg0, %c0_i32 : i32, i32
  }
  func.func @transform_2(%arg0: i32) -> (i32, i32) {
    %c0_i32 = arith.constant 0 : i32
    %c0_i32_0 = arith.constant 0 : i32
    return %arg0, %c0_i32 : i32, i32
  }
  func.func @transform_3(%arg0: i32) -> (i32, i32) {
    %c0_i32 = arith.constant 0 : i32
    %c0_i32_0 = arith.constant 0 : i32
    return %arg0, %c0_i32 : i32, i32
  }
  func.func @transform_4(%arg0: i32) -> (i32, i32) {
    %c0_i32 = arith.constant 0 : i32
    %c0_i32_0 = arith.constant 0 : i32
    %c0_i32_1 = arith.constant 0 : i32
    return %c0_i32, %c0_i32_0 : i32, i32
  }
  func.func @transform_5(%arg0: i32) -> (i32, i32) {
    %c0_i32 = arith.constant 0 : i32
    %c0_i32_0 = arith.constant 0 : i32
    %c0_i32_1 = arith.constant 0 : i32
    return %c0_i32, %c0_i32_0 : i32, i32
  }
  func.func @transform_6(%arg0: i32) -> (i32, i32) {
    %c0_i32 = arith.constant 0 : i32
    %c0_i32_0 = arith.constant 0 : i32
    %c0_i32_1 = arith.constant 0 : i32
    return %c0_i32, %c0_i32_0 : i32, i32
  }
  func.func @transform_7(%arg0: i32) -> (i32, i32) {
    %c0_i32 = arith.constant 0 : i32
    %c0_i32_0 = arith.constant 0 : i32
    return %arg0, %c0_i32 : i32, i32
  }
}

</mosaic_0001>

<bundles_post_ra>
// kernel: tree_lstm_cell_batched.1
= control target key start
LH: loop header
LB: loop body
LE: loop exit
PB: predicated region body
PF: predicated region fallthrough
CT: control target
= control target key end

     0   :  { %s3191_s0 = inlined_call_operand.hbm [shape: f32[64,128], index: 0, kind: input, shape index: {}]   ;;  %s3192_s1 = inlined_call_operand.hbm [shape: f32[64,128], index: 1, kind: input, shape index: {}]   ;;  %s3193_s2 = inlined_call_operand.hbm [shape: f32[64,128], index: 2, kind: input, shape index: {}]   ;;  %s3194_s3 = inlined_call_operand.hbm [shape: f32[64,128], index: 3, kind: input, shape index: {}]   ;;  %s3195_s4 = inlined_call_operand.hbm [shape: bf16[256,640], index: 4, kind: input, shape index: {}]   ;;  %s3196_s5 = inlined_call_operand.vmem [shape: f32[6,128], index: 5, kind: input, shape index: {}]   ;;  %s3197_s6 = inlined_call_operand.vmem [shape: f32[6,128], index: 6, kind: input, shape index: {}]   ;;  %s3198_s7 = inlined_call_operand.vmem [shape: f32[64,256], index: 7, kind: output, shape index: {}]  }
   0x1   :  { %3211 = sst [smem:[#allocation18_spill]] %s3191_s0 }
   0x2   :  { %3212 = sst [smem:[#allocation19_spill]] %s3192_s1 }
   0x3   :  { %3213 = sst [smem:[#allocation20_spill]] %s3195_s4 }
   0x4   :  { %12 = vsyncpa [#allocation4], 0 }
   0x5   :  { %14 = vsyncpa [#allocation4 + $0x1], 0 }
   0x6   :  { %15 = vsyncpa [#allocation6], 0 }
   0x7   :  { %17 = vsyncpa [#allocation6 + $0x1], 0 }
   0x8   :  { %18 = vsyncpa [#allocation9], 0 }
   0x9   :  { %20 = vsyncpa [#allocation9 + $0x1], 0  ;;  %s2572_s24 = smov 0   ;;  %s2574_s25 = smov 0  }
   0xa   :  { %s2576_s26 = smov 0   ;;  %s2578_s27 = smov 0  }
   0xb LB: > { %3214 = sst [smem:[#allocation15_spill]] %s2517_s26  ;;  %s2591_s28 = sadd.s32 4294967295, %s2521_s27   ;;  %s2521_s27 = sphi %s2578_s27, %s3236_s27   ;;  %s2517_s26 = sphi %s2576_s26, %s3238_s26   ;;  %s2513_s25 = sphi %s2574_s25, %s3240_s25   ;;  %s2509_s24 = sphi %s2572_s24, %s3239_s24  }
   0xc   : > { %s2594_s29 = sadd.s32 1, %s2521_s27   ;;  %s33_s8 = sadd.s32 1, %s2517_s26 }
   0xd   : > { %3215 = sst [smem:[#allocation16_spill]] %s2594_s29  ;;  %s30_s30 = ssub.s32 %s2521_s27, %s2594_s29 }
   0xe   : > { %p31_p0 = scmp.eq.s32.totalorder %s30_s30, 0  ;;  %p40_p1 = scmp.ne.s32.totalorder %s2517_s26, %s2513_s25 }
   0xf   : > { %p41_p2 = scmp.eq.s32.totalorder %s2521_s27, 0  ;;  %p46_p3 = scmp.ne.s32.totalorder %s2513_s25, %s2509_s24 }
  0x10   : > { %s2604_s9 = scalar_select %p31_p0, %s2517_s26, %s33_s8  }
  0x11   : > { %p2606_p4 = por %p41_p2, %p40_p1  ;;  %p3199_p5 = scmp.eq.s32.totalorder %s2591_s28, 0 }
  0x12   : > { %3216 = sst [smem:[#allocation17_spill]] %s2604_s9  ;;  %p1835_p6 = scmp.ge.s32.totalorder %s2521_s27, 1 }
  0x13   : > { %s3217_s10 = scalar_select %p2606_p4, 1, 0 }
  0x14   : > { %p224_p7 = scmp.lt.s32.totalorder %s2521_s27, 3  ;;  %p2615_p8 = por %p3199_p5, %p46_p3 }
  0x15   : > { %s2523_s13 = smov [#allocation10]   ;;  %s3203_s16 = sand.u32 1, %s2517_s26  }
  0x16   : > { %s3218_s11 = scalar_select %p2615_p8, 1, 0 }
  0x17   : > { %p2619_p9 = pnand %p1835_p6, %p224_p7  ;;  %s236_s14 = sshll.u32 %s2523_s13, 4  ;;  %s237_s14 = int_to_ptr.vmem [resolvable:$true] %s236_s14 }
  0x18   : > { %s2634_s17 = sshll.u32 %s2521_s27, 9  ;;  %s2638_s18 = sshll.u32 %s3203_s16, 5 }
  0x19   : > { %s3219_s12 = scalar_select %p2619_p9, 1, 0 }
  0x1a   : > { %p2030_p10 = pneg %p2619_p9  ;;  %s3221_s4 = sld [smem:[#allocation20_spill]] }
  0x1c   : > { %p2627_p11 = pnand %p2030_p10, %p3199_p5 }
  0x1e   : > { %p2329_p0 = pneg %p2627_p11 }
  0x20   : > { %s2327_s21 = scalar_lea.hbm %s3221_s4, 10240 }
  0x21   : > { %p2328_p13 = scmp.ne.s32.totalorder %s3221_s4, %s2327_s21  ;;  %p2334_p3 = scmp.lt.u32.totalorder %s2327_s21, %s3221_s4 }
  0x23   : > { %p2330_p1 = pnand %p2329_p0, %p2328_p13 }
  0x25   : > { %p2331_p2 = pneg %p2330_p1 }
  0x27   : > { %p2336_p6 = pnand %p2334_p3, %p2331_p2 }
  0x29   : > { %2339 = shalt.err (!%p2336_p6)
}
  0x2a   : > { %s2340_s8 = scalar_lea.vmem %s237_s14, 10240  ;;  %p2348_p12 = scmp.lt.s32.totalorder %s237_s14, %s237_s14 }
  0x2b   : > { %p2341_p7 = scmp.ne.s32.totalorder %s237_s14, %s2340_s8  ;;  %p2349_p8 = scmp.lt.s32.totalorder %s2340_s8, %s2340_s8 }
  0x2d   : > { %p2343_p10 = pnand %p2341_p7, %p2329_p0  ;;  %p2350_p9 = por %p2349_p8, %p2348_p12 }
  0x2f   : > { %p2344_p5 = pneg %p2343_p10 }
  0x31   : > { %p2351_p4 = pnand %p2350_p9, %p2344_p5 }
  0x33   : > { %2354 = shalt.err (!%p2351_p4)
}
  0x34   : > { %s2524_s13 = smov 320   ;;  %s2525_s19 = smov 20  }
  0x35   : > { %2033 = dma.hbm_to_vmem [thread:$0]  (!%p2627_p11), %s3221_s4, 10240, %s237_s14, [#allocation9], %s2524_s13, %s2524_s13, %s2525_s19  }
  0x36   : > { %p3222_p13 = scmp.ne.s32.totalorder %s3217_s10, 0  ;;  %p3223_p0 = scmp.lt.s32.totalorder %s2521_s27, 2 }
  0x37   : > { %s3202_s23 = sand.u32 1, %s2521_s27   ;;  %s3225_s1 = sld [smem:[#allocation19_spill]] }
  0x38   : > { %p2660_p1 = pnand %p3223_p0, %p3222_p13  ;;  %s281_s15 = scalar_lea.vmem [#allocation5], %s2638_s18 }
  0x39   : > { %s288_s20 = sshll.u32 %s281_s15, 4  ;;  %s2676_s10 = scalar_lea.sflag [#allocation6], %s3202_s23  ;;  %s2672_s20 = int_to_ptr.vmem [resolvable:$true] %s288_s20 }
  0x3a   : > { %p2682_p5 = pneg %p2660_p1 }
  0x3d   : > { %s2669_s8 = scalar_lea.hbm %s3225_s1, %s2634_s17  ;;  %s2360_s24 = scalar_lea.hbm %s3225_s1, 1024 }
  0x3e   : > { %s2355_s14 = scalar_lea.hbm %s2669_s8, 512  ;;  %p2361_p11 = scmp.lt.u32.totalorder %s2669_s8, %s3225_s1 }
  0x3f   : > { %p2356_p4 = scmp.ne.s32.totalorder %s2669_s8, %s2355_s14  ;;  %p2362_p12 = scmp.lt.u32.totalorder %s2360_s24, %s2355_s14 }
  0x40   : > { %p2364_p3 = scmp.lt.u32.totalorder %s2355_s14, %s2669_s8 }
  0x41   : > { %p2358_p8 = pnand %p2682_p5, %p2356_p4  ;;  %p2363_p2 = por %p2362_p12, %p2361_p11 }
  0x43   : > { %p2359_p9 = pneg %p2358_p8  ;;  %p2365_p6 = por %p2364_p3, %p2363_p2 }
  0x45   : > { %p2366_p7 = pnand %p2365_p6, %p2359_p9 }
  0x47   : > { %2369 = shalt.err (!%p2366_p7)
}
  0x48   : > { %s2370_s23 = scalar_lea.vmem %s2672_s20, 512  ;;  %s2526_s19 = smov [#allocation5]  }
  0x49   : > { %p2371_p10 = scmp.ne.s32.totalorder %s2672_s20, %s2370_s23  ;;  %s2375_s21 = sshll.u32 %s2526_s19, 4  ;;  %s2376_s21 = int_to_ptr.vmem [resolvable:$false] %s2375_s21 }
  0x4a   : > { %s2377_s30 = scalar_lea.vmem %s2376_s21, 1024  ;;  %p2378_p4 = scmp.lt.s32.totalorder %s2672_s20, %s2376_s21 }
  0x4b   : > { %p2373_p13 = pnand %p2371_p10, %p2682_p5  ;;  %p2379_p8 = scmp.lt.s32.totalorder %s2377_s30, %s2370_s23 }
  0x4d   : > { %p2374_p0 = pneg %p2373_p13  ;;  %p2380_p11 = por %p2379_p8, %p2378_p4 }
  0x4f   : > { %p2381_p12 = pnand %p2380_p11, %p2374_p0 }
  0x51   : > { %2384 = shalt.err (!%p2381_p12)
}
  0x52   : > { %s3204_s14 = smov 128   ;;  %s3206_s24 = smov 8  }
  0x53   : > { %2040 = dma.hbm_to_vmem [thread:$0]  (!%p2660_p1), %s2669_s8, 512, %s2672_s20, %s2676_s10, %s3204_s14, %s3204_s14, %s3206_s24  }
  0x54   : > { %s3227_s0 = sld [smem:[#allocation18_spill]]  ;;  %s260_s21 = scalar_lea.vmem [#allocation3], %s2638_s18 }
  0x55   : > { %s267_s30 = sshll.u32 %s260_s21, 4  ;;  %s2722_s4 = scalar_lea.hbm %s3193_s2, %s2634_s17  ;;  %s2716_s30 = int_to_ptr.vmem [resolvable:$true] %s267_s30 }
  0x56   : > { %s3228_s9 = sand.u32 1, %s2517_s26  }
  0x57   : > { %s2726_s8 = scalar_lea.sflag [#allocation4], %s3228_s9 }
  0x5a   : > { %s2713_s19 = scalar_lea.hbm %s3227_s0, %s2634_s17  ;;  %s2390_s14 = scalar_lea.hbm %s3227_s0, 1024 }
  0x5b   : > { %s2385_s20 = scalar_lea.hbm %s2713_s19, 512  ;;  %p2391_p6 = scmp.lt.u32.totalorder %s2713_s19, %s3227_s0 }
  0x5c   : > { %p2386_p9 = scmp.ne.s32.totalorder %s2713_s19, %s2385_s20  ;;  %p2392_p7 = scmp.lt.u32.totalorder %s2390_s14, %s2385_s20 }
  0x5d   : > { %p2394_p13 = scmp.lt.u32.totalorder %s2385_s20, %s2713_s19 }
  0x5e   : > { %p2388_p2 = pnand %p2386_p9, %p2682_p5  ;;  %p2393_p10 = por %p2392_p7, %p2391_p6 }
  0x60   : > { %p2389_p3 = pneg %p2388_p2  ;;  %p2395_p0 = por %p2394_p13, %p2393_p10 }
  0x62   : > { %p2396_p4 = pnand %p2395_p0, %p2389_p3 }
  0x64   : > { %2399 = shalt.err (!%p2396_p4)
}
  0x65   : > { %s2400_s1 = scalar_lea.vmem %s2716_s30, 512  ;;  %s2529_s9 = smov [#allocation3]  }
  0x66   : > { %p2401_p8 = scmp.ne.s32.totalorder %s2716_s30, %s2400_s1  ;;  %s2405_s16 = sshll.u32 %s2529_s9, 4  ;;  %s2406_s16 = int_to_ptr.vmem [resolvable:$false] %s2405_s16 }
  0x67   : > { %s2407_s24 = scalar_lea.vmem %s2406_s16, 1024  ;;  %p2408_p9 = scmp.lt.s32.totalorder %s2716_s30, %s2406_s16 }
  0x68   : > { %p2403_p11 = pnand %p2401_p8, %p2682_p5  ;;  %p2409_p2 = scmp.lt.s32.totalorder %s2407_s24, %s2400_s1 }
  0x6a   : > { %p2404_p12 = pneg %p2403_p11  ;;  %p2410_p6 = por %p2409_p2, %p2408_p9 }
  0x6c   : > { %p2411_p7 = pnand %p2410_p6, %p2404_p12 }
  0x6e   : > { %2414 = shalt.err (!%p2411_p7)
}
  0x6f   : > { %s3229_s14 = smov 8   ;;  %s3230_s20 = smov 128  }
  0x70   : > { %2037 = dma.hbm_to_vmem [thread:$0]  (!%p2660_p1), %s2713_s19, 512, %s2716_s30, %s2726_s8, %s3230_s20, %s3230_s20, %s3229_s14  }
  0x71   : > { %s302_s23 = scalar_lea.vmem [#allocation7], %s2638_s18  ;;  %s2760_s9 = scalar_lea.hbm %s3194_s3, %s2634_s17 }
  0x72   : > { %s309_s15 = sshll.u32 %s302_s23, 4  ;;  %s2415_s16 = scalar_lea.hbm %s2722_s4, 512  ;;  %s2754_s15 = int_to_ptr.vmem [resolvable:$true] %s309_s15 }
  0x73   : > { %p2416_p3 = scmp.ne.s32.totalorder %s2722_s4, %s2415_s16  ;;  %s2420_s26 = scalar_lea.hbm %s3193_s2, 1024 }
  0x74   : > { %p2421_p0 = scmp.lt.u32.totalorder %s2722_s4, %s3193_s2  ;;  %p2422_p4 = scmp.lt.u32.totalorder %s2420_s26, %s2415_s16 }
  0x75   : > { %p2418_p10 = pnand %p2416_p3, %p2682_p5  ;;  %p2424_p11 = scmp.lt.u32.totalorder %s2415_s16, %s2722_s4 }
  0x76   : > { %p2423_p8 = por %p2422_p4, %p2421_p0 }
  0x77   : > { %p2419_p13 = pneg %p2418_p10 }
  0x78   : > { %p2425_p12 = por %p2424_p11, %p2423_p8 }
  0x7a   : > { %p2426_p9 = pnand %p2425_p12, %p2419_p13 }
  0x7c   : > { %2429 = shalt.err (!%p2426_p9)
}
  0x7d   : > { %s2430_s17 = scalar_lea.vmem %s2754_s15, 512  ;;  %s2530_s0 = smov [#allocation7]  }
  0x7e   : > { %p2431_p2 = scmp.ne.s32.totalorder %s2754_s15, %s2430_s17  ;;  %s2435_s30 = sshll.u32 %s2530_s0, 4  ;;  %s2436_s30 = int_to_ptr.vmem [resolvable:$false] %s2435_s30 }
  0x7f   : > { %s2437_s29 = scalar_lea.vmem %s2436_s30, 1024  ;;  %p2438_p3 = scmp.lt.s32.totalorder %s2754_s15, %s2436_s30 }
  0x80   : > { %p2433_p6 = pnand %p2431_p2, %p2682_p5  ;;  %p2439_p10 = scmp.lt.s32.totalorder %s2437_s29, %s2430_s17 }
  0x82   : > { %p2434_p7 = pneg %p2433_p6  ;;  %p2440_p0 = por %p2439_p10, %p2438_p3 }
  0x84   : > { %p2441_p4 = pnand %p2440_p0, %p2434_p7 }
  0x86   : > { %2444 = shalt.err (!%p2441_p4)
}
  0x87   : > { %2043 = dma.hbm_to_vmem [thread:$0]  (!%p2660_p1), %s2722_s4, 512, %s2754_s15, %s2676_s10, %s3230_s20, %s3230_s20, %s3229_s14  }
  0x88   : > { %s323_s26 = scalar_lea.vmem [#allocation8], %s2638_s18  ;;  %s3231_s23 = sand.u32 1, %s2521_s27  }
  0x89   : > { %s330_s8 = sshll.u32 %s323_s26, 4  ;;  %s2792_s21 = scalar_lea.sflag [#allocation9], %s3231_s23  ;;  %s2788_s8 = int_to_ptr.vmem [resolvable:$true] %s330_s8 }
  0x8a   : > { %s2445_s1 = scalar_lea.hbm %s2760_s9, 512  ;;  %s2450_s19 = scalar_lea.hbm %s3194_s3, 1024 }
  0x8b   : > { %p2446_p13 = scmp.ne.s32.totalorder %s2760_s9, %s2445_s1  ;;  %p2451_p12 = scmp.lt.u32.totalorder %s2760_s9, %s3194_s3 }
  0x8c   : > { %p2452_p9 = scmp.lt.u32.totalorder %s2450_s19, %s2445_s1  ;;  %p2454_p6 = scmp.lt.u32.totalorder %s2445_s1, %s2760_s9 }
  0x8d   : > { %p2448_p8 = pnand %p2446_p13, %p2682_p5 }
  0x8e   : > { %p2453_p2 = por %p2452_p9, %p2451_p12 }
  0x8f   : > { %p2449_p11 = pneg %p2448_p8 }
  0x90   : > { %p2455_p7 = por %p2454_p6, %p2453_p2 }
  0x92   : > { %p2456_p3 = pnand %p2455_p7, %p2449_p11 }
  0x94   : > { %2459 = shalt.err (!%p2456_p3)
}
  0x95   : > { %s2460_s4 = scalar_lea.vmem %s2788_s8, 512  ;;  %s2531_s27 = smov [#allocation8]  }
  0x96   : > { %p2461_p10 = scmp.ne.s32.totalorder %s2788_s8, %s2460_s4  ;;  %s2465_s18 = sshll.u32 %s2531_s27, 4  ;;  %s2466_s18 = int_to_ptr.vmem [resolvable:$false] %s2465_s18 }
  0x97   : > { %s2467_s10 = scalar_lea.vmem %s2466_s18, 1024  ;;  %p2468_p13 = scmp.lt.s32.totalorder %s2788_s8, %s2466_s18 }
  0x98   : > { %p2463_p0 = pnand %p2461_p10, %p2682_p5  ;;  %p2469_p8 = scmp.lt.s32.totalorder %s2467_s10, %s2460_s4 }
  0x9a   : > { %p2464_p4 = pneg %p2463_p0  ;;  %p2470_p12 = por %p2469_p8, %p2468_p13 }
  0x9c   : > { %p2471_p9 = pnand %p2470_p12, %p2464_p4 }
  0x9e   : > { %2474 = shalt.err (!%p2471_p9)
}
  0x9f   : > { %2046 = dma.hbm_to_vmem [thread:$0]  (!%p2660_p1), %s2760_s9, 512, %s2788_s8, %s2792_s21, %s3230_s20, %s3230_s20, %s3229_s14  }
  0xa0   : > { %p3232_p5 = scmp.ne.s32.totalorder %s3219_s12, 0 }
  0xa1   : > { %s344_s13 = sand.u32 (!%p3232_p5), 1, %s2513_s25   ;;  %p3233_p11 = scmp.ne.s32.totalorder (!%p3232_p5), %s3218_s11, 0 }
  0xa2   : > { %342 = sbr.rel (%p3232_p5) target bundleno = 889 (0x379), region = 48  ;;  %s1851_s15 = sshll.u32 (!%p3232_p5), %s344_s13, 5 }
  0xa3   : > { %s345_s30 = scalar_lea.sflag (!%p3232_p5), [#allocation4], %s344_s13  ;;  %s2822_s29 = scalar_lea.vmem (!%p3232_p5), [#allocation3], %s1851_s15 }
  0xa9   : > { %2492 = dma.done.wait (%p3233_p11), %s345_s30, 512  }
  0xaa   : > { %2494 = vsyncadd (%p3233_p11), %s345_s30, 4294966784  ;;  %s353_s22 = sand.u32 1, %s2591_s28   ;;  %s2829_s14 = scalar_lea.vmem [#allocation5], %s1851_s15 }
  0xab   : > { %s354_s26 = scalar_lea.sflag [#allocation6], %s353_s22 }
  0xac   : > { %2496 = dma.done.wait (%p3233_p11), %s354_s26, 1024  }
  0xad   : > { %2498 = vsyncadd (%p3233_p11), %s354_s26, 4294966272  ;;  %s2835_s12 = scalar_lea.vmem [#allocation7], %s1851_s15  ;;  %s372_s20 = scalar_lea.sflag [#allocation9], %s353_s22 }
  0xae   : > { %s2837_s9 = scalar_lea.vmem [#allocation8], %s1851_s15 }
  0xaf   : > { %2500 = dma.done.wait (%p3233_p11), %s372_s20, 512  }
  0xb0   : > { %2502 = vsyncadd (%p3233_p11), %s372_s20, 4294966784  ;;  %p3234_p1 = scmp.eq.s32.totalorder %s2591_s28, 0 }
  0xb2   : > { %2504 = dma.done.wait (%p3234_p1), [#allocation9], 10240   ;;  %p3235_p2 = pmov %p3234_p1 }
  0xb3   : > { %v2087_v0 = vld [vmem:[#allocation10 + $0x4] ss:$20 sps:$4 sm:$0xff]   ;;  %v2089_v1 = vld [vmem:[#allocation10] ss:$20 sps:$4 sm:$0xff]   ;;  %v2092_v3 = vld [vmem:[#allocation10 + $0x8] ss:$20 sps:$4 sm:$0xff]  }
  0xb4   : > { %2506 = vsyncadd (%p3235_p2), [#allocation9], 4294957056  ;;  %970 = vmatprep.subr.bf16.mxu0 %v2087_v0  ;;  %v2090_v2 = vld [vmem:[#allocation10 + $0xc] ss:$20 sps:$4 sm:$0xff]   ;;  %v2095_v5 = vld [vmem:[#allocation10 + $0x28] ss:$20 sps:$4 sm:$0xff]  }
  0xb5   : > { %971 = vmatpush1.bf16.msra.mxu0 %v2089_v1  ;;  %v2093_v4 = vld [vmem:[#allocation10 + $0x2c] ss:$20 sps:$4 sm:$0xff]   ;;  %1023 = vmatprep.subr.bf16.mxu1 %v2090_v2  ;;  %v2096_v6 = vld [vmem:[#allocation10 + $0x34] ss:$20 sps:$4 sm:$0xff]   ;;  %v2098_v7 = vld [vmem:[#allocation10 + $0x30] ss:$20 sps:$4 sm:$0xff]  }
  0xb6   : > { %1024 = vmatpush1.bf16.msra.mxu1 %v2092_v3  ;;  %972 = vmatprep.subr.bf16.mxu0 %v2093_v4  ;;  %v2099_v8 = vld [vmem:[#allocation10 + $0x54] ss:$20 sps:$4 sm:$0xff]   ;;  %v2101_v9 = vld [vmem:[#allocation10 + $0x50] ss:$20 sps:$4 sm:$0xff]   ;;  %v2104_v12 = vld [vmem:[#allocation10 + $0x58] ss:$20 sps:$4 sm:$0xff]  }
  0xb7   : > { %1025 = vmatprep.subr.bf16.mxu1 %v2096_v6  ;;  %v2102_v10 = vld [vmem:[#allocation10 + $0x5c] ss:$20 sps:$4 sm:$0xff]   ;;  %v2108_v13 = vld [vmem:[#allocation10 + $0x84] ss:$20 sps:$4 sm:$0xff]   ;;  %v2110_v16 = vld [vmem:[#allocation10 + $0x80] ss:$20 sps:$4 sm:$0xff]  }
  0xb8   : > { %v2105_v11 = vld [vmem:[#allocation10 + $0x7c] ss:$20 sps:$4 sm:$0xff]   ;;  %v2107_v14 = vld [vmem:[#allocation10 + $0x78] ss:$20 sps:$4 sm:$0xff]   ;;  %v2113_v18 = vld [vmem:[#allocation10 + $0xa0] ss:$20 sps:$4 sm:$0xff]  }
  0xb9   : > { %973 = vmatpush1.bf16.msra.mxu0 %v2095_v5  ;;  %v2111_v15 = vld [vmem:[#allocation10 + $0xa4] ss:$20 sps:$4 sm:$0xff]   ;;  %v2114_v17 = vld [vmem:[#allocation10 + $0xac] ss:$20 sps:$4 sm:$0xff]   ;;  %v2116_v20 = vld [vmem:[#allocation10 + $0xa8] ss:$20 sps:$4 sm:$0xff]  }
  0xba   : > { %974 = vmatprep.subr.bf16.mxu0 %v2099_v8  ;;  %1026 = vmatpush1.bf16.msra.mxu1 %v2098_v7  ;;  %v2117_v19 = vld [vmem:[#allocation10 + $0xcc] ss:$20 sps:$4 sm:$0xff]   ;;  %v2120_v21 = vld [vmem:[#allocation10 + $0xd4] ss:$20 sps:$4 sm:$0xff]   ;;  %v2122_v24 = vld [vmem:[#allocation10 + $0xd0] ss:$20 sps:$4 sm:$0xff]  }
  0xbb   : > { %1027 = vmatprep.subr.bf16.mxu1 %v2102_v10  ;;  %v2119_v22 = vld [vmem:[#allocation10 + $0xc8] ss:$20 sps:$4 sm:$0xff]   ;;  %v2125_v26 = vld [vmem:[#allocation10 + $0xf0] ss:$20 sps:$4 sm:$0xff]   ;;  %v2128_v28 = vld [vmem:[#allocation10 + $0xf8] ss:$20 sps:$4 sm:$0xff]  }
  0xbc   : > { %v2123_v23 = vld [vmem:[#allocation10 + $0xf4] ss:$20 sps:$4 sm:$0xff]   ;;  %v2126_v25 = vld [vmem:[#allocation10 + $0xfc] ss:$20 sps:$4 sm:$0xff]   ;;  %v2132_v29 = vld [vmem:[#allocation10 + $0x124] ss:$20 sps:$4 sm:$0xff]  }
  0xbd   : > { %975 = vmatpush1.bf16.msra.mxu0 %v2101_v9  ;;  %v2129_v27 = vld [vmem:[#allocation10 + $0x11c] ss:$20 sps:$4 sm:$0xff]   ;;  %v2131_v30 = vld [vmem:[#allocation10 + $0x118] ss:$20 sps:$4 sm:$0xff]   ;;  %v2134_v32 = vld [vmem:[#allocation10 + $0x120] ss:$20 sps:$4 sm:$0xff]  }
  0xbe   : > { %976 = vmatprep.subr.bf16.mxu0 %v2105_v11  ;;  %1028 = vmatpush1.bf16.msra.mxu1 %v2104_v12  ;;  %v2135_v31 = vld [vmem:[#allocation10 + $0x144] ss:$20 sps:$4 sm:$0xff]   ;;  %v2138_v33 = vld [vmem:[#allocation10 + $0x14c] ss:$20 sps:$4 sm:$0xff]   ;;  %v2140_v36 = vld [vmem:[#allocation10 + $0x148] ss:$20 sps:$4 sm:$0xff]  }
  0xbf   : > { %1029 = vmatprep.subr.bf16.mxu1 %v2108_v13  ;;  %v2137_v34 = vld [vmem:[#allocation10 + $0x140] ss:$20 sps:$4 sm:$0xff]   ;;  %v2143_v38 = vld [vmem:[#allocation10 + $0x168] ss:$20 sps:$4 sm:$0xff]   ;;  %v2146_v40 = vld [vmem:[#allocation10 + $0x170] ss:$20 sps:$4 sm:$0xff]  }
  0xc0   : > { %v2141_v35 = vld [vmem:[#allocation10 + $0x16c] ss:$20 sps:$4 sm:$0xff]   ;;  %v2144_v37 = vld [vmem:[#allocation10 + $0x174] ss:$20 sps:$4 sm:$0xff]   ;;  %v2150_v41 = vld [vmem:[#allocation10 + $0x19c] ss:$20 sps:$4 sm:$0xff]  }
  0xc1   : > { %977 = vmatpush1.bf16.msra.mxu0 %v2107_v14  ;;  %v2147_v39 = vld [vmem:[#allocation10 + $0x194] ss:$20 sps:$4 sm:$0xff]   ;;  %v2149_v42 = vld [vmem:[#allocation10 + $0x190] ss:$20 sps:$4 sm:$0xff]   ;;  %v2152_v44 = vld [vmem:[#allocation10 + $0x198] ss:$20 sps:$4 sm:$0xff]  }
  0xc2   : > { %978 = vmatprep.subr.bf16.mxu0 %v2111_v15  ;;  %1030 = vmatpush1.bf16.msra.mxu1 %v2110_v16  ;;  %v2153_v43 = vld [vmem:[#allocation10 + $0x1bc] ss:$20 sps:$4 sm:$0xff]   ;;  %v2156_v45 = vld [vmem:[#allocation10 + $0x1c4] ss:$20 sps:$4 sm:$0xff]   ;;  %v447_v48 = vld [vmem:[%s2829_s14 + $0x8] sm:$0xff] }
  0xc3   : > { %1031 = vmatprep.subr.bf16.mxu1 %v2114_v17  ;;  %v446_v46 = vld [vmem:[%s2829_s14] sm:$0xff]  ;;  %v2155_v47 = vld [vmem:[#allocation10 + $0x1b8] ss:$20 sps:$4 sm:$0xff]   ;;  %v2164_v55 = vld [vmem:[#allocation10 + $0x1e8] ss:$20 sps:$4 sm:$0xff]  }
  0xc4   : > { %v2159_v49 = vld [vmem:[#allocation10 + $0x1e4] ss:$20 sps:$4 sm:$0xff]   ;;  %v2849_v50 = vpack.c.bf16 %v447_v48, %v446_v46  ;;  %v2158_v51 = vld [vmem:[#allocation10 + $0x1c0] ss:$20 sps:$4 sm:$0xff]   ;;  %v2167_v56 = vld [vmem:[#allocation10 + $0x208] ss:$20 sps:$4 sm:$0xff]  }
  0xc5   : > { %979 = vmatpush1.bf16.msra.mxu0 %v2113_v18  ;;  %v2162_v52 = vld [vmem:[#allocation10 + $0x1ec] ss:$20 sps:$4 sm:$0xff]   ;;  %v2168_v57 = vld [vmem:[#allocation10 + $0x214] ss:$20 sps:$4 sm:$0xff]   ;;  %v2170_v58 = vld [vmem:[#allocation10 + $0x210] ss:$20 sps:$4 sm:$0xff]  }
  0xc6   : > { %980 = vmatprep.subr.bf16.mxu0 %v2117_v19  ;;  %1032 = vmatpush1.bf16.msra.mxu1 %v2116_v20  ;;  %v2161_v53 = vld [vmem:[#allocation10 + $0x1e0] ss:$20 sps:$4 sm:$0xff]   ;;  %v2173_v60 = vld [vmem:[#allocation10 + $0x230] ss:$20 sps:$4 sm:$0xff]   ;;  %v2176_v62 = vld [vmem:[#allocation10 + $0x238] ss:$20 sps:$4 sm:$0xff]  }
  0xc7   : > { %1033 = vmatprep.subr.bf16.mxu1 %v2120_v21  ;;  %1002 = vmatprep.mubr.bf16.mxu0 %v2849_v50  ;;  %v2165_v54 = vld [vmem:[#allocation10 + $0x20c] ss:$20 sps:$4 sm:$0xff]   ;;  %v2171_v59 = vld [vmem:[#allocation10 + $0x234] ss:$20 sps:$4 sm:$0xff]   ;;  %v2174_v61 = vld [vmem:[#allocation10 + $0x23c] ss:$20 sps:$4 sm:$0xff]  }
  0xc8   : > { %1055 = vmatprep.mubr.bf16.mxu1 %v2849_v50  ;;  %v2177_v63 = vld [vmem:[#allocation10 + $0x25c] ss:$20 sps:$4 sm:$0xff]   ;;  %v2179_v0 = vld [vmem:[#allocation10 + $0x258] ss:$20 sps:$4 sm:$0xff]   ;;  %v438_v2 = vld [vmem:[%s2822_s29] sm:$0xff] }
  0xc9   : > { %981 = vmatpush1.bf16.msra.mxu0 %v2119_v22  ;;  %v2180_v1 = vld [vmem:[#allocation10 + $0x264] ss:$20 sps:$4 sm:$0xff]   ;;  %v439_v3 = vld [vmem:[%s2822_s29 + $0x8] sm:$0xff]  ;;  %v2182_v5 = vld [vmem:[#allocation10 + $0x260] ss:$20 sps:$4 sm:$0xff]  }
  0xca   : > { %982 = vmatprep.subr.bf16.mxu0 %v2123_v23  ;;  %1034 = vmatpush1.bf16.msra.mxu1 %v2122_v24  ;;  %v2183_v4 = vld [vmem:[#allocation10 + $0x150] ss:$20 sps:$4 sm:$0xff]   ;;  %v2855_v6 = vpack.c.bf16 %v439_v3, %v438_v2  ;;  %v449_v8 = vld [vmem:[%s2829_s14 + $0x18] sm:$0xff]  ;;  %v2187_v13 = vld [vmem:[#allocation10 + $0x1a0] ss:$20 sps:$4 sm:$0xff]  }
  0xcb   : > { %1035 = vmatprep.subr.bf16.mxu1 %v2126_v25  ;;  %v448_v7 = vld [vmem:[%s2829_s14 + $0x10] sm:$0xff]  ;;  %v2185_v10 = vld [vmem:[#allocation10 + $0x178] ss:$20 sps:$4 sm:$0xff]   ;;  %v2189_v18 = vld [vmem:[#allocation10 + $0x1c8] ss:$20 sps:$4 sm:$0xff]   ;;  %s1856_s14 = sshll.u32 %s2591_s28, 2 }
  0xcc   : > { %v2184_v9 = vld [vmem:[#allocation10 + $0x10] ss:$20 sps:$4 sm:$0xff]   ;;  %v451_v11 = vpack.c.bf16 %v449_v8, %v448_v7  ;;  %v2186_v12 = vld [vmem:[#allocation10 + $0x38] ss:$20 sps:$4 sm:$0xff]   ;;  %v2188_v16 = vld [vmem:[#allocation10 + $0x60] ss:$20 sps:$4 sm:$0xff]  }
  0xcd   : > { %983 = vmatpush1.bf16.msra.mxu0 %v2125_v26  ;;  %v440_v14 = vld [vmem:[%s2822_s29 + $0x10] sm:$0xff]  ;;  %v441_v15 = vld [vmem:[%s2822_s29 + $0x18] sm:$0xff]  ;;  %p431_p6 = scmp.lt.s32.totalorder %s1856_s14, 7 }
  0xce   : > { %984 = vmatprep.subr.bf16.mxu0 %v2129_v27  ;;  %1036 = vmatpush1.bf16.msra.mxu1 %v2128_v28  ;;  %v443_v17 = vpack.c.bf16 %v441_v15, %v440_v14  ;;  %v2190_v19 = vld [vmem:[#allocation10 + $0x88] ss:$20 sps:$4 sm:$0xff]   ;;  %v2191_v20 = vld [vmem:[#allocation10 + $0x1f0] ss:$20 sps:$4 sm:$0xff]   ;;  %v2193_v22 = vld [vmem:[#allocation10 + $0x218] ss:$20 sps:$4 sm:$0xff]  }
  0xcf   : > { %1037 = vmatprep.subr.bf16.mxu1 %v2132_v29  ;;  %v2192_v21 = vld [vmem:[#allocation10 + $0xb0] ss:$20 sps:$4 sm:$0xff]   ;;  %v2194_v23 = vld [vmem:[#allocation10 + $0xd8] ss:$20 sps:$4 sm:$0xff]   ;;  %v2195_v24 = vld [vmem:[#allocation10 + $0x240] ss:$20 sps:$4 sm:$0xff]  }
  0xd0   : > { %v2196_v25 = vld [vmem:[#allocation10 + $0x100] ss:$20 sps:$4 sm:$0xff]   ;;  %v2197_v26 = vld [vmem:[#allocation10 + $0x268] ss:$20 sps:$4 sm:$0xff]   ;;  %s3242_s14 = smov (!%p431_p6, %s1856_s14), 7 }
  0xd1   : > { %985 = vmatpush1.bf16.msra.mxu0 %v2131_v30  ;;  %v2198_v27 = vld [vmem:[#allocation10 + $0x128] ss:$20 sps:$4 sm:$0xff]   ;;  %s1973_s20 = sshll.u32 %s3242_s14, 4 }
  0xd2   : > { %986 = vmatprep.subr.bf16.mxu0 %v2135_v31  ;;  %1038 = vmatpush1.bf16.msra.mxu1 %v2134_v32  ;;  %s3166_s21 = scalar_lea.vmem %s3198_s7, %s1973_s20 }
  0xd3   : > { %1039 = vmatprep.subr.bf16.mxu1 %v2138_v33 }
  0xd5   : > { %987 = vmatpush1.bf16.msra.mxu0 %v2137_v34 }
  0xd6   : > { %988 = vmatprep.subr.bf16.mxu0 %v2141_v35  ;;  %1040 = vmatpush1.bf16.msra.mxu1 %v2140_v36 }
  0xd7   : > { %1041 = vmatprep.subr.bf16.mxu1 %v2144_v37 }
  0xd9   : > { %989 = vmatpush1.bf16.msra.mxu0 %v2143_v38 }
  0xda   : > { %990 = vmatprep.subr.bf16.mxu0 %v2147_v39  ;;  %1042 = vmatpush1.bf16.msra.mxu1 %v2146_v40 }
  0xdb   : > { %1043 = vmatprep.subr.bf16.mxu1 %v2150_v41 }
  0xdd   : > { %991 = vmatpush1.bf16.msra.mxu0 %v2149_v42 }
  0xde   : > { %992 = vmatprep.subr.bf16.mxu0 %v2153_v43  ;;  %1044 = vmatpush1.bf16.msra.mxu1 %v2152_v44 }
  0xdf   : > { %1045 = vmatprep.subr.bf16.mxu1 %v2156_v45 }
  0xe1   : > { %993 = vmatpush1.bf16.msra.mxu0 %v2155_v47 }
  0xe2   : > { %994 = vmatprep.subr.bf16.mxu0 %v2159_v49  ;;  %1046 = vmatpush1.bf16.msra.mxu1 %v2158_v51 }
  0xe3   : > { %1047 = vmatprep.subr.bf16.mxu1 %v2162_v52 }
  0xe5   : > { %995 = vmatpush1.bf16.msra.mxu0 %v2161_v53 }
  0xe6   : > { %996 = vmatprep.subr.bf16.mxu0 %v2165_v54  ;;  %1048 = vmatpush1.bf16.msra.mxu1 %v2164_v55 }
  0xe7   : > { %1049 = vmatprep.subr.bf16.mxu1 %v2168_v57 }
  0xe9   : > { %997 = vmatpush1.bf16.msra.mxu0 %v2167_v56 }
  0xea   : > { %998 = vmatprep.subr.bf16.mxu0 %v2171_v59  ;;  %1050 = vmatpush1.bf16.msra.mxu1 %v2170_v58 }
  0xeb   : > { %1051 = vmatprep.subr.bf16.mxu1 %v2174_v61 }
  0xed   : > { %999 = vmatpush1.bf16.msra.mxu0 %v2173_v60 }
  0xee   : > { %1000 = vmatprep.subr.bf16.mxu0 %v2177_v63  ;;  %1052 = vmatpush1.bf16.msra.mxu1 %v2176_v62 }
  0xef   : > { %1053 = vmatprep.subr.bf16.mxu1 %v2180_v1 }
  0xf1   : > { %1001 = vmatpush1.bf16.msra.mxu0 %v2179_v0 }
  0xf2   : > { %1974 = vmatprep.subr.bf16.mxu0 %v2183_v4  ;;  %1054 = vmatpush1.bf16.msra.mxu1 %v2182_v5 }
  0xf3   : > { %2002 = vmatprep.subr.bf16.mxu1 %v2183_v4 }
  0xf4   : > { %1003 = vmatmul.mubr.bf16.vlgmr.msra.gmra.mrb[0].mxu0 %v2855_v6 }
  0xf5   : > { %1975 = vmatpush3.bf16.msra.mxu0 %v2184_v9  ;;  %1012 = vmatprep.mubr.bf16.mxu0 %v451_v11 }
  0xf6   : > { %1056 = vmatmul.mubr.bf16.vlgmr.msra.gmra.mrb[0].mxu1 %v2855_v6  ;;  %1976 = vmatprep.subr.bf16.mxu0 %v2185_v10 }
  0xf7   : > { %2010 = vmatpush3.bf16.msra.mxu1 %v2184_v9  ;;  %1065 = vmatprep.mubr.bf16.mxu1 %v451_v11 }
  0xf8   : > { %2003 = vmatprep.subr.bf16.mxu1 %v2185_v10 }
  0xf9   : > { %1977 = vmatpush3.bf16.msra.mxu0 %v2186_v12 }
  0xfa   : > { %1978 = vmatprep.subr.bf16.mxu0 %v2187_v13 }
  0xfb   : > { %2011 = vmatpush3.bf16.msra.mxu1 %v2186_v12 }
  0xfc   : > { %1013 = vmatmul.mubr.bf16.gmra.mrb[4].mxu0 %v443_v17  ;;  %2004 = vmatprep.subr.bf16.mxu1 %v2187_v13 }
  0xfd   : > { %1979 = vmatpush3.bf16.msra.mxu0 %v2188_v16  ;;  %1108 = vmatprep.mubr.bf16.mxu0 %v2849_v50 }
  0xfe   : > { %1066 = vmatmul.mubr.bf16.gmra.mrb[4].mxu1 %v443_v17  ;;  %1980 = vmatprep.subr.bf16.mxu0 %v2189_v18 }
  0xff   : > { %2012 = vmatpush3.bf16.msra.mxu1 %v2188_v16  ;;  %1116 = vmatprep.mubr.bf16.mxu1 %v451_v11 }
 0x100   : > { %2005 = vmatprep.subr.bf16.mxu1 %v2189_v18 }
 0x101   : > { %1981 = vmatpush3.bf16.msra.mxu0 %v2190_v19 }
 0x102   : > { %1982 = vmatprep.subr.bf16.mxu0 %v2191_v20 }
 0x103   : > { %2013 = vmatpush3.bf16.msra.mxu1 %v2190_v19 }
 0x104   : > { %2006 = vmatprep.subr.bf16.mxu1 %v2191_v20 }
 0x105   : > { %1983 = vmatpush3.bf16.msra.mxu0 %v2192_v21 }
 0x106   : > { %1984 = vmatprep.subr.bf16.mxu0 %v2193_v22 }
 0x107   : > { %2014 = vmatpush3.bf16.msra.mxu1 %v2192_v21 }
 0x108   : > { %2007 = vmatprep.subr.bf16.mxu1 %v2193_v22 }
 0x109   : > { %1985 = vmatpush3.bf16.msra.mxu0 %v2194_v23 }
 0x10a   : > { %1986 = vmatprep.subr.bf16.mxu0 %v2195_v24 }
 0x10b   : > { %2015 = vmatpush3.bf16.msra.mxu1 %v2194_v23 }
 0x10c   : > { %2008 = vmatprep.subr.bf16.mxu1 %v2195_v24 }
 0x10d   : > { %1987 = vmatpush3.bf16.msra.mxu0 %v2196_v25 }
 0x10e   : > { %1988 = vmatprep.subr.bf16.mxu0 %v2197_v26 }
 0x10f   : > { %2016 = vmatpush3.bf16.msra.mxu1 %v2196_v25 }
 0x110   : > { %2009 = vmatprep.subr.bf16.mxu1 %v2197_v26 }
 0x111   : > { %1989 = vmatpush3.bf16.msra.mxu0 %v2198_v27 }
 0x113   : > { %2017 = vmatpush3.bf16.msra.mxu1 %v2198_v27 }
 0x114   : > { %1109 = vmatmul.mubr.bf16.vlgmr.msra.gmra.mrb[8].mxu0 %v2855_v6 }
 0x116   : > { %1117 = vmatmul.mubr.bf16.vlgmr.msra.gmra.mrb[8].mxu1 %v443_v17 }
 0x1c7   : > { %v2865_v28 = vpop.f32.mrb[0].mxu0 }
 0x1c8   : > { %1125 = vadd.xlane.f32.xlu0 %v2865_v28  ;;  %v2868_v29 = vpop.f32.mrb[1].mxu0  ;;  %v1133_v37 = vmul.f32 %v2865_v28, %v2865_v28 }
 0x1c9   : > { %v2870_v30 = vpop.f32.mrb[0].mxu1  ;;  %v2872_v31 = vpop.f32.mrb[2].mxu0  ;;  %v1227_v46 = vmul.f32 %v2868_v29, %v2868_v29 }
 0x1ca   : > { %v2874_v32 = vpop.f32.mrb[1].mxu1  ;;  %1127 = vadd.xlane.f32.xlu1 %v2872_v31  ;;  %v2877_v33 = vpop.f32.mrb[3].mxu0  ;;  %v1321_v41 = vmul.f32 %v2870_v30, %v2870_v30  ;;  %v1134_v48 = vmul.f32 %v2872_v31, %v2872_v31 }
 0x1cb   : > { %v2879_v34 = vpop.f32.mrb[2].mxu1  ;;  %v1228_v49 = vmul.f32 %v2877_v33, %v2877_v33  ;;  %v1415_v8 = vmul.f32 %v2874_v32, %v2874_v32 }
 0x1cc   : > { %v2881_v35 = vpop.f32.mrb[3].mxu1  ;;  %1313 = vadd.xlane.f32.xlu0 %v2870_v30  ;;  %v1322_v47 = vmul.f32 %v2879_v34, %v2879_v34 }
 0x1cd   : > { %v1416_v9 = vmul.f32 %v2881_v35, %v2881_v35 }
 0x1ce   : > { %1315 = vadd.xlane.f32.xlu1 %v2879_v34 }
 0x1cf   : > { %v2885_v36 = vpop.f32.mrb[4].mxu0 }
 0x1d0   : > { %1219 = vadd.xlane.f32.xlu0 %v2868_v29  ;;  %v2890_v38 = vpop.f32.mrb[5].mxu0  ;;  %v1135_v56 = vmul.f32 %v2885_v36, %v2885_v36 }
 0x1d1   : > { %v2892_v39 = vpop.f32.mrb[4].mxu1  ;;  %v2894_v40 = vpop.f32.mrb[6].mxu0  ;;  %v1229_v0 = vmul.f32 %v2890_v38, %v2890_v38 }
 0x1d2   : > { %1137 = vadd.xlane.f32.xlu1 %v1133_v37  ;;  %v2898_v42 = vpop.f32.mrb[5].mxu1  ;;  %v2900_v43 = vpop.f32.mrb[7].mxu0  ;;  %v1323_v51 = vmul.f32 %v2892_v39, %v2892_v39  ;;  %v1136_v2 = vmul.f32 %v2894_v40, %v2894_v40 }
 0x1d3   : > { %v2902_v44 = vpop.f32.mrb[6].mxu1  ;;  %v1230_v3 = vmul.f32 %v2900_v43, %v2900_v43  ;;  %v1417_v10 = vmul.f32 %v2898_v42, %v2898_v42 }
 0x1d4   : > { %1325 = vadd.xlane.f32.xlu0 %v1321_v41  ;;  %v2904_v45 = vpop.f32.mrb[7].mxu1  ;;  %v1324_v1 = vmul.f32 %v2902_v44, %v2902_v44 }
 0x1d5   : > { %v1418_v11 = vmul.f32 %v2904_v45, %v2904_v45 }
 0x1d6   : > { %1221 = vadd.xlane.f32.xlu1 %v2877_v33 }
 0x1d8   : > { %1231 = vadd.xlane.f32.xlu0 %v1227_v46 }
 0x1da   : > { %1327 = vadd.xlane.f32.xlu1 %v1322_v47 }
 0x1dc   : > { %1139 = vadd.xlane.f32.xlu0 %v1134_v48 }
 0x1de   : > { %1317 = vadd.xlane.f32.xlu1 %v2892_v39 }
 0x1e0   : > { %1233 = vadd.xlane.f32.xlu0 %v1228_v49 }
 0x1e2   : > { %1223 = vadd.xlane.f32.xlu1 %v2890_v38 }
 0x1e4   : > { %1129 = vadd.xlane.f32.xlu0 %v2885_v36 }
 0x1e6   : > { %1131 = vadd.xlane.f32.xlu1 %v2894_v40 }
 0x1e7   : > { %v1990_v50 = vpop.f32.mrb[8].mxu0 }
 0x1e8   : > { %1319 = vadd.xlane.f32.xlu0 %v2902_v44  ;;  %v1991_v52 = vpop.f32.mrb[9].mxu0 }
 0x1e9   : > { %v2922_v53 = vadd.f32 %v1991_v52, %v1990_v50  ;;  %v1993_v54 = vpop.f32.mrb[10].mxu0  ;;  %v1996_v55 = vpop.f32.mrb[8].mxu1 }
 0x1ea   : > { %1329 = vadd.xlane.f32.xlu1 %v1323_v51  ;;  %v1994_v57 = vpop.f32.mrb[11].mxu0  ;;  %v1997_v58 = vpop.f32.mrb[9].mxu1 }
 0x1eb   : > { %v2926_v59 = vadd.f32 %v1994_v57, %v1993_v54  ;;  %v2928_v60 = vadd.f32 %v1997_v58, %v1996_v55  ;;  %v1999_v61 = vpop.f32.mrb[10].mxu1  ;;  %v1509_v4 = vmul.f32 %v2922_v53, %v2922_v53 }
 0x1ec   : > { %1141 = vadd.xlane.f32.xlu0 %v1135_v56  ;;  %v2000_v62 = vpop.f32.mrb[11].mxu1 }
 0x1ed   : > { %v2930_v63 = vadd.f32 %v2000_v62, %v1999_v61  ;;  %v1510_v5 = vmul.f32 %v2926_v59, %v2926_v59  ;;  %v1511_v6 = vmul.f32 %v2928_v60, %v2928_v60 }
 0x1ee   : > { %1225 = vadd.xlane.f32.xlu1 %v2900_v43 }
 0x1ef   : > { %v1512_v7 = vmul.f32 %v2930_v63, %v2930_v63 }
 0x1f0   : > { %1235 = vadd.xlane.f32.xlu0 %v1229_v0 }
 0x1f2   : > { %1331 = vadd.xlane.f32.xlu1 %v1324_v1 }
 0x1f4   : > { %1143 = vadd.xlane.f32.xlu0 %v1136_v2 }
 0x1f6   : > { %1237 = vadd.xlane.f32.xlu1 %v1230_v3 }
 0x1f8   : > { %1501 = vadd.xlane.f32.xlu0 %v2922_v53 }
 0x1fa   : > { %1503 = vadd.xlane.f32.xlu1 %v2926_v59 }
 0x1fc   : > { %1505 = vadd.xlane.f32.xlu0 %v2928_v60 }
 0x1fe   : > { %1513 = vadd.xlane.f32.xlu1 %v1509_v4 }
 0x200   : > { %1507 = vadd.xlane.f32.xlu0 %v2930_v63 }
 0x202   : > { %1515 = vadd.xlane.f32.xlu1 %v1510_v5 }
 0x204   : > { %1517 = vadd.xlane.f32.xlu0 %v1511_v6 }
 0x206   : > { %1519 = vadd.xlane.f32.xlu1 %v1512_v7 }
 0x208   : > { %1407 = vadd.xlane.f32.xlu0 %v2874_v32 }
 0x20a   : > { %1409 = vadd.xlane.f32.xlu1 %v2881_v35 }
 0x20c   : > { %1411 = vadd.xlane.f32.xlu0 %v2898_v42 }
 0x20e   : > { %1419 = vadd.xlane.f32.xlu1 %v1415_v8 }
 0x210   : > { %1413 = vadd.xlane.f32.xlu0 %v2904_v45 }
 0x212   : > { %1421 = vadd.xlane.f32.xlu1 %v1416_v9 }
 0x214   : > { %1423 = vadd.xlane.f32.xlu0 %v1417_v10 }
 0x216   : > { %1425 = vadd.xlane.f32.xlu1 %v1418_v11 }
 0x255   : > { %v1126_v12 = vpop.xlane.xlu0 %1125 }
 0x256   : > { %v1145_v16 = vmul.f32 0.0078125, %v1126_v12 }
 0x257   : > { %v1128_v13 = vpop.xlane.xlu1 %1127 }
 0x258   : > { %v1153_v19 = vmul.f32 %v1145_v16, %v1145_v16  ;;  %v2973_v47 = vmul.f32 0.0078125, %v1128_v13  ;;  %v1163_v13 = vsub.f32 %v2865_v28, %v1145_v16 }
 0x259   : > { %v1314_v14 = vpop.xlane.xlu0 %1313 }
 0x25a   : > { %v2965_v20 = vmul.f32 0.0078125, %v1314_v14  ;;  %v1154_v57 = vmul.f32 %v2973_v47, %v2973_v47 }
 0x25b   : > { %v1316_v15 = vpop.xlane.xlu1 %1315 }
 0x25c   : > { %v1341_v27 = vmul.f32 %v2965_v20, %v2965_v20  ;;  %v2971_v37 = vmul.f32 0.0078125, %v1316_v15  ;;  %v1351_v16 = vsub.f32 %v2870_v30, %v2965_v20  ;;  %v1164_v30 = vsub.f32 %v2872_v31, %v2973_v47 }
 0x25d   : > { %v1220_v17 = vpop.xlane.xlu0 %1219 }
 0x25e   : > { %v2967_v25 = vmul.f32 0.0078125, %v1220_v17  ;;  %v1342_v52 = vmul.f32 %v2971_v37, %v2971_v37 }
 0x25f   : > { %v1138_v18 = vpop.xlane.xlu1 %1137 }
 0x260   : > { %v1149_v21 = vmul.f32 0.0078125, %v1138_v18  ;;  %v1247_v49 = vmul.f32 %v2967_v25, %v2967_v25  ;;  %v1257_v20 = vsub.f32 %v2868_v29, %v2967_v25 }
 0x261   : > { %v1326_v22 = vpop.xlane.xlu0 %1325 }
 0x262   : > { %v1157_v23 = vsub.f32 %v1149_v21, %v1153_v19  ;;  %v1337_v24 = vmul.f32 0.0078125, %v1326_v22  ;;  %v2991_v21 = vld [vmem:[%s3196_s5] ss:$0 sm:$0xff] }
 0x263   : > { %v1222_v26 = vpop.xlane.xlu1 %1221 }
 0x264   : > { %v1167_v41 = vadd.f32 1e-05, %v1157_v23  ;;  %v1345_v48 = vsub.f32 %v1337_v24, %v1341_v27  ;;  %v2981_v0 = vmul.f32 0.0078125, %v1222_v26 }
 0x265   : > { %v1232_v46 = vpop.xlane.xlu0 %1231 }
 0x266   : > { %v1243_v50 = vmul.f32 0.0078125, %v1232_v46  ;;  %2199 = vrsqrt.f32 %v1167_v41  ;;  %v1355_v58 = vadd.f32 1e-05, %v1345_v48  ;;  %v1248_v7 = vmul.f32 %v2981_v0, %v2981_v0  ;;  %v3003_v48 = vld [vmem:[%s3197_s6] ss:$0 sm:$0xff] }
 0x267   : > { %v1328_v51 = vpop.xlane.xlu1 %1327  ;;  %v1258_v29 = vsub.f32 %v2877_v33, %v2981_v0 }
 0x268   : > { %v1338_v54 = vmul.f32 0.0078125, %v1328_v51  ;;  %v1251_v55 = vsub.f32 %v1243_v50, %v1247_v49  ;;  %2201 = vrsqrt.f32 %v1355_v58  ;;  %v1352_v58 = vsub.f32 %v2879_v34, %v2971_v37  ;;  %v3030_v34 = vld [vmem:[%s3196_s5 + $0x1] ss:$0 sm:$0xff] }
 0x269   : > { %v1140_v56 = vpop.xlane.xlu0 %1139 }
 0x26a   : > { %v1346_v61 = vsub.f32 %v1338_v54, %v1342_v52  ;;  %v1150_v62 = vmul.f32 0.0078125, %v1140_v56  ;;  %v1261_v2 = vadd.f32 1e-05, %v1251_v55 }
 0x26b   : > { %v1318_v1 = vpop.xlane.xlu1 %1317 }
 0x26c   : > { %v1158_v3 = vsub.f32 %v1150_v62, %v1154_v57  ;;  %v1356_v4 = vadd.f32 1e-05, %v1346_v61  ;;  %2203 = vrsqrt.f32 %v1261_v2  ;;  %v2986_v17 = vmul.f32 0.0078125, %v1318_v1  ;;  %v3018_v61 = vld [vmem:[%s3196_s5 + $0x2] ss:$0 sm:$0xff] }
 0x26d   : > { %v1234_v5 = vpop.xlane.xlu0 %1233 }
 0x26e   : > { %v1168_v6 = vadd.f32 1e-05, %v1158_v3  ;;  %v1244_v8 = vmul.f32 0.0078125, %v1234_v5  ;;  %2205 = vrsqrt.f32 %v1356_v4  ;;  %v1343_v26 = vmul.f32 %v2986_v17, %v2986_v17 }
 0x26f   : > { %v1224_v9 = vpop.xlane.xlu1 %1223 }
 0x270   : > { %v1252_v10 = vsub.f32 %v1244_v8, %v1248_v7  ;;  %v2200_v12 = vpop.eup %2199  ;;  %2207 = vrsqrt.f32 %v1168_v6  ;;  %v3005_v49 = vmul.f32 0.0078125, %v1224_v9 }
 0x271   : > { %v1130_v11 = vpop.xlane.xlu0 %1129  ;;  %v1175_v18 = vmul.f32 %v2200_v12, %v1163_v13 }
 0x272   : > { %v1262_v14 = vadd.f32 1e-05, %v1252_v10  ;;  %v2993_v22 = vmul.f32 0.0078125, %v1130_v11  ;;  %v2202_v24 = vpop.eup %2201  ;;  %v1249_v4 = vmul.f32 %v3005_v49, %v3005_v49  ;;  %v3040_v10 = vld [vmem:[%s3197_s6 + $0x2] ss:$0 sm:$0xff] }
 0x273   : > { %v1132_v15 = vpop.xlane.xlu1 %1131  ;;  %v1183_v27 = vmul.f32 %v2991_v21, %v1175_v18  ;;  %v1363_v55 = vmul.f32 %v2202_v24, %v1351_v16  ;;  %v3050_v24 = vld [vmem:[%s3197_s6 + $0x1] ss:$0 sm:$0xff] }
 0x274   : > { %2209 = vrsqrt.f32 %v1262_v14  ;;  %v1155_v50 = vmul.f32 %v2993_v22, %v2993_v22  ;;  %v3025_v47 = vmul.f32 0.0078125, %v1132_v15 }
 0x275   : > { %v1320_v19 = vpop.xlane.xlu0 %1319  ;;  %v1191_v31 = vadd.f32 %v3003_v48, %v1183_v27  ;;  %v1371_v7 = vmul.f32 %v3018_v61, %v1363_v55 }
 0x276   : > { %v2204_v46 = vpop.eup %2203  ;;  %v3020_v62 = vmul.f32 0.0078125, %v1320_v19  ;;  %v1156_v18 = vmul.f32 %v3025_v47, %v3025_v47 }
 0x277   : > { %v1330_v23 = vpop.xlane.xlu1 %1329  ;;  %v1269_v25 = vmul.f32 %v2204_v46, %v1257_v20  ;;  %v1941_v14 = vmul.f32 -1.442695, %v1191_v31  ;;  %v1379_v27 = vadd.f32 %v3040_v10, %v1371_v7 }
 0x278   : > { %v1339_v28 = vmul.f32 0.0078125, %v1330_v23  ;;  %v2206_v54 = vpop.eup %2205  ;;  %v1344_v12 = vmul.f32 %v3020_v62, %v3020_v62 }
 0x279   : > { %v1142_v41 = vpop.xlane.xlu0 %1141  ;;  %v1364_v37 = vmul.f32 %v2206_v54, %v1352_v58  ;;  %v1277_v15 = vmul.f32 %v3030_v34, %v1269_v25 }
 0x27a   : > { %v1347_v51 = vsub.f32 %v1339_v28, %v1343_v26  ;;  %v1151_v52 = vmul.f32 0.0078125, %v1142_v41  ;;  %v2208_v57 = vpop.eup %2207 }
 0x27b   : > { %v1226_v56 = vpop.xlane.xlu1 %1225  ;;  %v1176_v8 = vmul.f32 %v2208_v57, %v1164_v30  ;;  %v1372_v26 = vmul.f32 %v3018_v61, %v1364_v37  ;;  %v1285_v55 = vadd.f32 %v3050_v24, %v1277_v15 }
 0x27c   : > { %v1357_v1 = vadd.f32 1e-05, %v1347_v51  ;;  %v1159_v2 = vsub.f32 %v1151_v52, %v1155_v50  ;;  %v3035_v33 = vmul.f32 0.0078125, %v1226_v56 }
 0x27d   : > { %v1236_v3 = vpop.xlane.xlu0 %1235  ;;  %v1184_v41 = vmul.f32 %v2991_v21, %v1176_v8  ;;  %v1380_v57 = vadd.f32 %v3040_v10, %v1372_v26 }
 0x27e   : > { %2211 = vrsqrt.f32 %v1357_v1  ;;  %v1169_v5 = vadd.f32 1e-05, %v1159_v2  ;;  %v2210_v6 = vpop.eup %2209  ;;  %v1245_v0 = vmul.f32 0.0078125, %v1236_v3  ;;  %v1250_v46 = vmul.f32 %v3035_v33, %v3035_v33 }
 0x27f   : > { %v1332_v9 = vpop.xlane.xlu1 %1331  ;;  %v1270_v11 = vmul.f32 %v2210_v6, %v1258_v29  ;;  %v1953_v2 = vmul.f32 -1.442695, %v1379_v27  ;;  %v1192_v31 = vadd.f32 %v3003_v48, %v1184_v41  ;;  %v1353_v29 = vsub.f32 %v2892_v39, %v2986_v17 }
 0x280   : > { %v1340_v13 = vmul.f32 0.0078125, %v1332_v9  ;;  %v1253_v19 = vsub.f32 %v1245_v0, %v1249_v4  ;;  %2213 = vrsqrt.f32 %v1169_v5  ;;  %v1947_v6 = vmul.f32 -1.442695, %v1285_v55 }
 0x281   : > { %v1144_v23 = vpop.xlane.xlu0 %1143  ;;  %v1278_v52 = vmul.f32 %v3030_v34, %v1270_v11  ;;  %v1954_v0 = vmul.f32 -1.442695, %v1380_v57  ;;  %v1259_v9 = vsub.f32 %v2890_v38, %v3005_v49  ;;  %v1165_v11 = vsub.f32 %v2885_v36, %v2993_v22 }
 0x282   : > { %v1348_v28 = vsub.f32 %v1340_v13, %v1344_v12  ;;  %v1152_v16 = vmul.f32 0.0078125, %v1144_v23  ;;  %v1263_v50 = vadd.f32 1e-05, %v1253_v19  ;;  %v1942_v39 = vmul.f32 -1.442695, %v1192_v31 }
 0x283   : > { %v1238_v51 = vpop.xlane.xlu1 %1237  ;;  %v1286_v37 = vadd.f32 %v3050_v24, %v1278_v52  ;;  %v1166_v17 = vsub.f32 %v2894_v40, %v3025_v47  ;;  %v1354_v40 = vsub.f32 %v2902_v44, %v3020_v62  ;;  %v1260_v41 = vsub.f32 %v2900_v43, %v3035_v33 }
 0x284   : > { %v1358_v54 = vadd.f32 1e-05, %v1348_v28  ;;  %v1160_v30 = vsub.f32 %v1152_v16, %v1156_v18  ;;  %v1246_v20 = vmul.f32 0.0078125, %v1238_v51  ;;  %2215 = vrsqrt.f32 %v1263_v50 }
 0x285   : > { %v1502_v56 = vpop.xlane.xlu0 %1501  ;;  %v1948_v15 = vmul.f32 -1.442695, %v1286_v37 }
 0x286   : > { %2217 = vrsqrt.f32 %v1358_v54  ;;  %v1170_v58 = vadd.f32 1e-05, %v1160_v30  ;;  %v1254_v1 = vsub.f32 %v1246_v20, %v1250_v46  ;;  %v3064_v5 = vmul.f32 0.0078125, %v1502_v56 }
 0x287   : > { %v1504_v25 = vpop.xlane.xlu1 %1503  ;;  %2219 = vpow2.f32 %v1941_v14 }
 0x288   : > { %v2212_v3 = vpop.eup %2211  ;;  %v1264_v4 = vadd.f32 1e-05, %v1254_v1  ;;  %2221 = vrsqrt.f32 %v1170_v58  ;;  %v1529_v18 = vmul.f32 %v3064_v5, %v3064_v5  ;;  %v3075_v19 = vmul.f32 0.0078125, %v1504_v25 }
 0x289   : > { %v1365_v7 = vmul.f32 %v2212_v3, %v1353_v29  ;;  %v1506_v8 = vpop.xlane.xlu0 %1505 }
 0x28a   : > { %2223 = vrsqrt.f32 %v1264_v4  ;;  %v2214_v14 = vpop.eup %2213  ;;  %v3078_v49 = vmul.f32 0.0078125, %v1506_v8  ;;  %v1530_v52 = vmul.f32 %v3075_v19, %v3075_v19 }
 0x28b   : > { %2225 = vpow2.f32 %v1953_v2  ;;  %v1373_v12 = vmul.f32 %v3018_v61, %v1365_v7  ;;  %v1514_v13 = vpop.xlane.xlu1 %1513  ;;  %v1177_v22 = vmul.f32 %v2214_v14, %v1165_v11 }
 0x28c   : > { %v1525_v38 = vmul.f32 0.0078125, %v1514_v13  ;;  %2227 = vpow2.f32 %v1947_v6  ;;  %v1531_v30 = vmul.f32 %v3078_v49, %v3078_v49 }
 0x28d   : > { %v1381_v36 = vadd.f32 %v3040_v10, %v1373_v12  ;;  %v1508_v23 = vpop.xlane.xlu0 %1507  ;;  %2229 = vpow2.f32 %v1954_v0  ;;  %v1185_v27 = vmul.f32 %v2991_v21, %v1177_v22 }
 0x28e   : > { %v1533_v47 = vsub.f32 %v1525_v38, %v1529_v18  ;;  %v3082_v26 = vmul.f32 0.0078125, %v1508_v23  ;;  %v2216_v28 = vpop.eup %2215  ;;  %2231 = vpow2.f32 %v1942_v39 }
 0x28f   : > { %v1955_v16 = vmul.f32 -1.442695, %v1381_v36  ;;  %v1516_v46 = vpop.xlane.xlu1 %1515  ;;  %2233 = vpow2.f32 %v1948_v15  ;;  %v1271_v51 = vmul.f32 %v2216_v28, %v1259_v9  ;;  %v1193_v44 = vadd.f32 %v3003_v48, %v1185_v27 }
 0x290   : > { %v2218_v50 = vpop.eup %2217  ;;  %v1543_v54 = vadd.f32 1e-05, %v1533_v47  ;;  %v1526_v20 = vmul.f32 0.0078125, %v1516_v46  ;;  %v1532_v43 = vmul.f32 %v3082_v26, %v3082_v26 }
 0x291   : > { %v1366_v62 = vmul.f32 %v2218_v50, %v1354_v40  ;;  %v1518_v55 = vpop.xlane.xlu0 %1517  ;;  %v2220_v56 = vpop.eup %2219  ;;  %v1279_v57 = vmul.f32 %v3030_v34, %v1271_v51  ;;  %v1943_v1 = vmul.f32 -1.442695, %v1193_v44  ;;  %v1539_v40 = vsub.f32 %v2922_v53, %v3064_v5 }
 0x292   : > { %2235 = vrsqrt.f32 %v1543_v54  ;;  %v1527_v33 = vmul.f32 0.0078125, %v1518_v55  ;;  %v2222_v58 = vpop.eup %2221  ;;  %v1534_v31 = vsub.f32 %v1526_v20, %v1530_v52  ;;  %v1540_v53 = vsub.f32 %v2926_v59, %v3075_v19 }
 0x293   : > { %2237 = vpow2.f32 %v1955_v16  ;;  %v1374_v2 = vmul.f32 %v3018_v61, %v1366_v62  ;;  %v1520_v29 = vpop.xlane.xlu1 %1519  ;;  %v1287_v3 = vadd.f32 %v3050_v24, %v1279_v57  ;;  %v1178_v37 = vmul.f32 %v2222_v58, %v1166_v17 }
 0x294   : > { %v2224_v25 = vpop.eup %2223  ;;  %v1535_v4 = vsub.f32 %v1527_v33, %v1531_v30  ;;  %v1528_v6 = vmul.f32 0.0078125, %v1520_v29  ;;  %2239 = vpow2.f32 %v1943_v1  ;;  %v1544_v9 = vadd.f32 1e-05, %v1534_v31 }
 0x295   : > { %v2226_v7 = vpop.eup %2225  ;;  %v1382_v8 = vadd.f32 %v3040_v10, %v1374_v2  ;;  %v1272_v0 = vmul.f32 %v2224_v25, %v1260_v41  ;;  %v1949_v11 = vmul.f32 -1.442695, %v1287_v3  ;;  %v1186_v39 = vmul.f32 %v2991_v21, %v1178_v37 }
 0x296   : > { %v1545_v12 = vadd.f32 1e-05, %v1535_v4  ;;  %v1536_v13 = vsub.f32 %v1528_v6, %v1532_v43  ;;  %v2228_v61 = vpop.eup %2227  ;;  %2241 = vrsqrt.f32 %v1544_v9  ;;  %v1395_v27 = vadd.f32 1.0, %v2226_v7 }
 0x297   : > { %v1956_v14 = vmul.f32 -1.442695, %v1382_v8  ;;  %v1280_v15 = vmul.f32 %v3030_v34, %v1272_v0  ;;  %v2230_v18 = vpop.eup %2229  ;;  %2243 = vpow2.f32 %v1949_v11  ;;  %v1194_v17 = vadd.f32 %v3003_v48, %v1186_v39  ;;  %v1963_v34 = vld [vmem:[%s3196_s5 + $0x4] ss:$0 sm:$0xff] }
 0x298   : > { %v1546_v38 = vadd.f32 1e-05, %v1536_v13  ;;  %v2232_v36 = vpop.eup %2231  ;;  %v1207_v48 = vadd.f32 1.0, %v2220_v56  ;;  %v1301_v41 = vadd.f32 1.0, %v2228_v61  ;;  %v1396_v5 = vadd.f32 1.0, %v2230_v18  ;;  %v1575_v8 = vld [vmem:[%s2835_s12] sm:$0xff] }
 0x299   : > { %2245 = vpow2.f32 %v1956_v14  ;;  %v1288_v10 = vadd.f32 %v3050_v24, %v1280_v15  ;;  %v2234_v22 = vpop.eup %2233  ;;  %v1944_v23 = vmul.f32 -1.442695, %v1194_v17  ;;  %v1964_v24 = vld [vmem:[%s3197_s6 + $0x4] ss:$0 sm:$0xff]  ;;  %v1208_v54 = vadd.f32 1.0, %v2232_v36 }
 0x29a   : > { %2247 = vrsqrt.f32 %v1545_v12  ;;  %v1302_v30 = vadd.f32 1.0, %v2234_v22  ;;  %v1541_v55 = vsub.f32 %v2928_v60, %v3078_v49  ;;  %v1542_v59 = vsub.f32 %v2930_v63, %v3082_v26  ;;  %v1579_v11 = vld [vmem:[%s2837_s9] sm:$0xff] }
 0x29b   : > { %v1950_v21 = vmul.f32 -1.442695, %v1288_v10  ;;  %2249 = vrsqrt.f32 %v1546_v38  ;;  %v1576_v38 = vld [vmem:[%s2835_s12 + $0x8] sm:$0xff] }
 0x29c   : > { %v2236_v47 = vpop.eup %2235  ;;  %2251 = vpow2.f32 %v1944_v23  ;;  %v1580_v23 = vld [vmem:[%s2837_s9 + $0x8] sm:$0xff] }
 0x29d   : > { %v2238_v28 = vpop.eup %2237  ;;  %2253 = vpow2.f32 %v1950_v21  ;;  %v1551_v16 = vmul.f32 %v2236_v47, %v1539_v40 }
 0x29e   : > { %v2240_v46 = vpop.eup %2239  ;;  %2255 = vrcp.f32 %v1207_v48  ;;  %v1397_v56 = vadd.f32 1.0, %v2238_v28 }
 0x29f   : > { %v1559_v50 = vmul.f32 %v1963_v34, %v1551_v16  ;;  %2257 = vrcp.f32 %v1395_v27  ;;  %v1209_v43 = vadd.f32 1.0, %v2240_v46 }
 0x2a0   : > { %v2242_v51 = vpop.eup %2241  ;;  %2259 = vrcp.f32 %v1301_v41 }
 0x2a1   : > { %v1567_v52 = vadd.f32 %v1964_v24, %v1559_v50  ;;  %v2244_v44 = vpop.eup %2243  ;;  %v1552_v62 = vmul.f32 %v2242_v51, %v1540_v53  ;;  %v1578_v53 = vld [vmem:[%s2835_s12 + $0x18] sm:$0xff] }
 0x2a2   : > { %v1303_v29 = vadd.f32 1.0, %v2244_v44 }
 0x2a3   : > { %v2246_v20 = vpop.eup %2245  ;;  %2261 = vtanh.f32 %v1567_v52  ;;  %v1560_v19 = vmul.f32 %v1963_v34, %v1552_v62  ;;  %v1582_v62 = vld [vmem:[%s2837_s9 + $0x18] sm:$0xff] }
 0x2a4   : > { %v2248_v57 = vpop.eup %2247  ;;  %2263 = vrcp.f32 %v1396_v5  ;;  %v1398_v4 = vadd.f32 1.0, %v2246_v20 }
 0x2a5   : > { %v2250_v33 = vpop.eup %2249  ;;  %v1553_v58 = vmul.f32 %v2248_v57, %v1541_v55  ;;  %2265 = vrcp.f32 %v1208_v54  ;;  %v1568_v2 = vadd.f32 %v1964_v24, %v1560_v19 }
 0x2a6   : > { %v2252_v1 = vpop.eup %2251  ;;  %v1554_v31 = vmul.f32 %v2250_v33, %v1542_v59  ;;  %2267 = vrcp.f32 %v1302_v30 }
 0x2a7   : > { %v2254_v25 = vpop.eup %2253  ;;  %v1561_v60 = vmul.f32 %v1963_v34, %v1553_v58  ;;  %2269 = vrcp.f32 %v1397_v56  ;;  %v1210_v49 = vadd.f32 1.0, %v2252_v1  ;;  %v1408_v1 = vpop.xlane.xlu0 %1407 }
 0x2a8   : > { %v1562_v3 = vmul.f32 %v1963_v34, %v1554_v31  ;;  %2271 = vrcp.f32 %v1209_v43  ;;  %v1304_v26 = vadd.f32 1.0, %v2254_v25  ;;  %v2256_v37 = vpop.eup %2255  ;;  %v1577_v34 = vld [vmem:[%s2835_s12 + $0x10] sm:$0xff] }
 0x2a9   : > { %v1569_v63 = vadd.f32 %v1964_v24, %v1561_v60  ;;  %2273 = vtanh.f32 %v1568_v2  ;;  %v2258_v6 = vpop.eup %2257  ;;  %v1587_v13 = vmul.f32 %v2256_v37, %v1575_v8  ;;  %v1410_v2 = vpop.xlane.xlu1 %1409 }
 0x2aa   : > { %2275 = vrcp.f32 %v1303_v29  ;;  %v1570_v7 = vadd.f32 %v1964_v24, %v1562_v3  ;;  %v2260_v0 = vpop.eup %2259  ;;  %v1581_v24 = vld [vmem:[%s2837_s9 + $0x10] sm:$0xff] }
 0x2ab   : > { %2277 = vrcp.f32 %v1210_v49  ;;  %v1595_v18 = vmul.f32 %v2260_v0, %v1579_v11  ;;  %v1412_v31 = vpop.xlane.xlu0 %1411  ;;  %v1427_v49 = vmul.f32 0.0078125, %v1408_v1 }
 0x2ac   : > { %2279 = vtanh.f32 %v1569_v63 }
 0x2ad   : > { %v2262_v9 = vpop.eup %2261  ;;  %2281 = vrcp.f32 %v1304_v26  ;;  %v1420_v29 = vpop.xlane.xlu1 %1419  ;;  %v1435_v63 = vmul.f32 %v1427_v49, %v1427_v49  ;;  %v1428_v26 = vmul.f32 0.0078125, %v1410_v2 }
 0x2ae   : > { %v2264_v39 = vpop.eup %2263  ;;  %v1583_v12 = vmul.f32 %v2262_v9, %v2258_v6  ;;  %2283 = vrcp.f32 %v1398_v4  ;;  %v1431_v3 = vmul.f32 0.0078125, %v1420_v29  ;;  %v1429_v4 = vmul.f32 0.0078125, %v1412_v31 }
 0x2af   : > { %v2266_v61 = vpop.eup %2265  ;;  %2285 = vtanh.f32 %v1570_v7  ;;  %v1414_v25 = vpop.xlane.xlu0 %1413  ;;  %v1436_v11 = vmul.f32 %v1428_v26, %v1428_v26 }
 0x2b0   : > { %v2268_v14 = vpop.eup %2267  ;;  %v1591_v15 = vadd.f32 %v1587_v13, %v1583_v12  ;;  %v1588_v47 = vmul.f32 %v2266_v61, %v1576_v38  ;;  %v1439_v7 = vsub.f32 %v1431_v3, %v1435_v63  ;;  %v1430_v8 = vmul.f32 0.0078125, %v1414_v25 }
 0x2b1   : > { %v2270_v17 = vpop.eup %2269  ;;  %v1596_v27 = vmul.f32 %v2268_v14, %v1580_v23  ;;  %v1422_v60 = vpop.xlane.xlu1 %1421  ;;  %v1437_v12 = vmul.f32 %v1429_v4, %v1429_v4  ;;  %v1445_v23 = vsub.f32 %v2874_v32, %v1427_v49  ;;  %v1958_v32 = vld [vmem:[%s3197_s6 + $0x3] ss:$0 sm:$0xff] }
 0x2b2   : > { %v2272_v36 = vpop.eup %2271  ;;  %v3119_v10 = vadd.f32 %v1595_v18, %v1591_v15  ;;  %v1432_v0 = vmul.f32 0.0078125, %v1422_v60  ;;  %v1449_v13 = vadd.f32 1e-05, %v1439_v7  ;;  %v1438_v61 = vmul.f32 %v1430_v8, %v1430_v8 }
 0x2b3   : > { %v2274_v22 = vpop.eup %2273  ;;  %v1589_v50 = vmul.f32 %v2272_v36, %v1577_v34  ;;  %v1424_v37 = vpop.xlane.xlu0 %1423 }
 0x2b4   : > { %v2276_v21 = vpop.eup %2275  ;;  %1603 = vadd.xlane.f32.xlu0 %v3119_v10  ;;  %v1584_v40 = vmul.f32 %v2274_v22, %v2264_v39  ;;  %v1611_v56 = vmul.f32 %v3119_v10, %v3119_v10  ;;  %v1433_v9 = vmul.f32 0.0078125, %v1424_v37  ;;  %v1440_v14 = vsub.f32 %v1432_v0, %v1436_v11 }
 0x2b5   : > { %v2278_v48 = vpop.eup %2277  ;;  %v1597_v44 = vmul.f32 %v2276_v21, %v1581_v24  ;;  %v1426_v6 = vpop.xlane.xlu1 %1425  ;;  %2287 = vrsqrt.f32 %v1449_v13  ;;  %v1448_v24 = vsub.f32 %v2904_v45, %v1430_v8 }
 0x2b6   : > { %v2280_v28 = vpop.eup %2279  ;;  %v1592_v16 = vadd.f32 %v1588_v47, %v1584_v40  ;;  %v1590_v20 = vmul.f32 %v2278_v48, %v1578_v53  ;;  %v1434_v39 = vmul.f32 0.0078125, %v1426_v6  ;;  %v1441_v15 = vsub.f32 %v1433_v9, %v1437_v12  ;;  %v1957_v47 = vld [vmem:[%s3196_s5 + $0x3] ss:$0 sm:$0xff] }
 0x2b7   : > { %v2282_v41 = vpop.eup %2281  ;;  %v1585_v46 = vmul.f32 %v2280_v28, %v2270_v17  ;;  %v1450_v17 = vadd.f32 1e-05, %v1440_v14  ;;  %v1446_v48 = vsub.f32 %v2881_v35, %v1428_v26 }
 0x2b8   : > { %v2284_v5 = vpop.eup %2283  ;;  %v3126_v51 = vadd.f32 %v1596_v27, %v1592_v16  ;;  %v1598_v59 = vmul.f32 %v2282_v41, %v1582_v62  ;;  %v1442_v18 = vsub.f32 %v1434_v39, %v1438_v61  ;;  %v1451_v38 = vadd.f32 1e-05, %v1441_v15 }
 0x2b9   : > { %v2286_v52 = vpop.eup %2285  ;;  %v1593_v54 = vadd.f32 %v1589_v50, %v1585_v46  ;;  %2289 = vrsqrt.f32 %v1450_v17  ;;  %v1447_v16 = vsub.f32 %v2898_v42, %v1429_v4  ;;  %v1965_v17 = vld [vmem:[%s3196_s5 + $0x5] ss:$0 sm:$0xff] }
 0x2ba   : > { %1605 = vadd.xlane.f32.xlu1 %v3126_v51  ;;  %v1586_v30 = vmul.f32 %v2286_v52, %v2284_v5  ;;  %v1612_v43 = vmul.f32 %v3126_v51, %v3126_v51  ;;  %v1452_v36 = vadd.f32 1e-05, %v1442_v18  ;;  %2291 = vrsqrt.f32 %v1451_v38 }
 0x2bb   : > { %v3130_v55 = vadd.f32 %v1597_v44, %v1593_v54 }
 0x2bc   : > { %v1594_v57 = vadd.f32 %v1590_v20, %v1586_v30  ;;  %2293 = vrsqrt.f32 %v1452_v36 }
 0x2bd   : > { %1607 = vadd.xlane.f32.xlu0 %v3130_v55  ;;  %v1613_v33 = vmul.f32 %v3130_v55, %v3130_v55 }
 0x2be   : > { %1615 = vadd.xlane.f32.xlu1 %v1611_v56  ;;  %v3135_v19 = vadd.f32 %v1598_v59, %v1594_v57 }
 0x2bf   : > { %v2288_v22 = vpop.eup %2287 }
 0x2c0   : > { %v1614_v58 = vmul.f32 %v3135_v19, %v3135_v19  ;;  %v1457_v21 = vmul.f32 %v2288_v22, %v1445_v23  ;;  %v1966_v22 = vld [vmem:[%s3197_s6 + $0x5] ss:$0 sm:$0xff] }
 0x2c1   : > { %1609 = vadd.xlane.f32.xlu0 %v3135_v19 }
 0x2c2   : > { %1617 = vadd.xlane.f32.xlu1 %v1612_v43  ;;  %v1465_v27 = vmul.f32 %v1957_v47, %v1457_v21 }
 0x2c3   : > { %v2290_v40 = vpop.eup %2289 }
 0x2c4   : > { %v2292_v34 = vpop.eup %2291  ;;  %v1458_v41 = vmul.f32 %v2290_v40, %v1446_v48  ;;  %v1473_v54 = vadd.f32 %v1958_v32, %v1465_v27 }
 0x2c5   : > { %1619 = vadd.xlane.f32.xlu0 %v1613_v33  ;;  %v1459_v50 = vmul.f32 %v2292_v34, %v1447_v16 }
 0x2c6   : > { %1621 = vadd.xlane.f32.xlu1 %v1614_v58  ;;  %v2294_v28 = vpop.eup %2293  ;;  %v1466_v44 = vmul.f32 %v1957_v47, %v1458_v41  ;;  %v1959_v57 = vmul.f32 -1.442695, %v1473_v54 }
 0x2c7   : > { %v1460_v53 = vmul.f32 %v2294_v28, %v1448_v24  ;;  %v1467_v35 = vmul.f32 %v1957_v47, %v1459_v50 }
 0x2c8   : > { %v1474_v59 = vadd.f32 %v1958_v32, %v1466_v44  ;;  %2295 = vpow2.f32 %v1959_v57 }
 0x2c9   : > { %v1468_v30 = vmul.f32 %v1957_v47, %v1460_v53  ;;  %v1475_v58 = vadd.f32 %v1958_v32, %v1467_v35 }
 0x2ca   : > { %v1960_v3 = vmul.f32 -1.442695, %v1474_v59 }
 0x2cb   : > { %v1476_v1 = vadd.f32 %v1958_v32, %v1468_v30  ;;  %v1961_v37 = vmul.f32 -1.442695, %v1475_v58 }
 0x2cd   : > { %v1962_v8 = vmul.f32 -1.442695, %v1476_v1 }
 0x2d2   : > { %v2296_v14 = vpop.eup %2295 }
 0x2d3   : > { %v1489_v36 = vadd.f32 1.0, %v2296_v14 }
 0x341   : > { %v1604_v46 = vpop.xlane.xlu0 %1603 }
 0x342   : > { %v1623_v52 = vmul.f32 0.0078125, %v1604_v46 }
 0x344   : > { %v1631_v42 = vmul.f32 %v1623_v52, %v1623_v52  ;;  %v1641_v15 = vsub.f32 %v3119_v10, %v1623_v52 }
 0x347   : > { %v1606_v5 = vpop.xlane.xlu1 %1605 }
 0x348   : > { %v1624_v56 = vmul.f32 0.0078125, %v1606_v5 }
 0x34a   : > { %v1608_v62 = vpop.xlane.xlu0 %1607  ;;  %v1632_v29 = vmul.f32 %v1624_v56, %v1624_v56  ;;  %v1642_v21 = vsub.f32 %v3126_v51, %v1624_v56 }
 0x34b   : > { %v1616_v20 = vpop.xlane.xlu1 %1615  ;;  %v1625_v2 = vmul.f32 0.0078125, %v1608_v62 }
 0x34c   : > { %v1627_v45 = vmul.f32 0.0078125, %v1616_v20 }
 0x34d   : > { %v1633_v4 = vmul.f32 %v1625_v2, %v1625_v2  ;;  %v1643_v27 = vsub.f32 %v3130_v55, %v1625_v2 }
 0x34e   : > { %v1635_v43 = vsub.f32 %v1627_v45, %v1631_v42  ;;  %v1610_v33 = vpop.xlane.xlu0 %1609 }
 0x34f   : > { %v1618_v31 = vpop.xlane.xlu1 %1617  ;;  %v1626_v60 = vmul.f32 0.0078125, %v1610_v33 }
 0x350   : > { %v1645_v25 = vadd.f32 1e-05, %v1635_v43  ;;  %v1628_v49 = vmul.f32 0.0078125, %v1618_v31 }
 0x351   : > { %v1634_v0 = vmul.f32 %v1626_v60, %v1626_v60  ;;  %v1644_v51 = vsub.f32 %v3135_v19, %v1626_v60 }
 0x352   : > { %2297 = vrsqrt.f32 %v1645_v25  ;;  %v1636_v63 = vsub.f32 %v1628_v49, %v1632_v29  ;;  %v1620_v26 = vpop.xlane.xlu0 %1619 }
 0x353   : > { %v1629_v6 = vmul.f32 0.0078125, %v1620_v26  ;;  %v1622_v7 = vpop.xlane.xlu1 %1621  ;;  %2299 = vpow2.f32 %v1960_v3 }
 0x354   : > { %v1646_v9 = vadd.f32 1e-05, %v1636_v63  ;;  %v1630_v11 = vmul.f32 0.0078125, %v1622_v7 }
 0x355   : > { %v1637_v39 = vsub.f32 %v1629_v6, %v1633_v4 }
 0x356   : > { %2301 = vrsqrt.f32 %v1646_v9  ;;  %v1638_v12 = vsub.f32 %v1630_v11, %v1634_v0 }
 0x357   : > { %2303 = vpow2.f32 %v1961_v37  ;;  %v1647_v13 = vadd.f32 1e-05, %v1637_v39 }
 0x358   : > { %2305 = vpow2.f32 %v1962_v8  ;;  %v1648_v61 = vadd.f32 1e-05, %v1638_v12 }
 0x359   : > { %2307 = vrsqrt.f32 %v1647_v13 }
 0x35a   : > { %2309 = vrsqrt.f32 %v1648_v61 }
 0x35b   : > { %2311 = vrcp.f32 %v1489_v36 }
 0x35c   : > { %v2298_v18 = vpop.eup %2297 }
 0x35d   : > { %v1653_v38 = vmul.f32 %v2298_v18, %v1641_v15  ;;  %v2300_v23 = vpop.eup %2299 }
 0x35e   : > { %v1490_v16 = vadd.f32 1.0, %v2300_v23 }
 0x35f   : > { %v1661_v40 = vmul.f32 %v1965_v17, %v1653_v38 }
 0x360   : > { %v2302_v47 = vpop.eup %2301 }
 0x361   : > { %v2304_v10 = vpop.eup %2303  ;;  %v1669_v34 = vadd.f32 %v1966_v22, %v1661_v40  ;;  %v1654_v48 = vmul.f32 %v2302_v47, %v1642_v21 }
 0x362   : > { %v2306_v28 = vpop.eup %2305  ;;  %v1491_v32 = vadd.f32 1.0, %v2304_v10 }
 0x363   : > { %v2308_v24 = vpop.eup %2307  ;;  %2313 = vtanh.f32 %v1669_v34  ;;  %1685 = vst [vmem:[%s3166_s21 + $0x8] sm:$0xff] %v1669_v34  ;;  %v1662_v41 = vmul.f32 %v1965_v17, %v1654_v48  ;;  %v1492_v53 = vadd.f32 1.0, %v2306_v28 }
 0x364   : > { %v2310_v46 = vpop.eup %2309  ;;  %v1655_v50 = vmul.f32 %v2308_v24, %v1643_v27  ;;  %2315 = vrcp.f32 %v1490_v16 }
 0x365   : > { %v1670_v5 = vadd.f32 %v1966_v22, %v1662_v41  ;;  %v1656_v52 = vmul.f32 %v2310_v46, %v1644_v51  ;;  %v2312_v62 = vpop.eup %2311 }
 0x366   : > { %v1663_v54 = vmul.f32 %v1965_v17, %v1655_v50 }
 0x367   : > { %2317 = vtanh.f32 %v1670_v5  ;;  %1686 = vst [vmem:[%s3166_s21 + $0x18] sm:$0xff] %v1670_v5  ;;  %v1664_v55 = vmul.f32 %v1965_v17, %v1656_v52 }
 0x368   : > { %2319 = vrcp.f32 %v1491_v32  ;;  %v1671_v44 = vadd.f32 %v1966_v22, %v1663_v54 }
 0x369   : > { %2321 = vrcp.f32 %v1492_v53  ;;  %v1672_v19 = vadd.f32 %v1966_v22, %v1664_v55 }
 0x36a   : > { %2323 = vtanh.f32 %v1671_v44  ;;  %1687 = vst [vmem:[%s3166_s21 + $0x28] sm:$0xff] %v1671_v44 }
 0x36b   : > { %2325 = vtanh.f32 %v1672_v19  ;;  %1688 = vst [vmem:[%s3166_s21 + $0x38] sm:$0xff] %v1672_v19 }
 0x36d   : > { %v2314_v35 = vpop.eup %2313 }
 0x36e   : > { %v1677_v30 = vmul.f32 %v2314_v35, %v2312_v62  ;;  %v2316_v20 = vpop.eup %2315 }
 0x370   : > { %1681 = vst [vmem:[%s3166_s21] sm:$0xff] %v1677_v30 }
 0x371   : > { %v2318_v42 = vpop.eup %2317 }
 0x372   : > { %v2320_v56 = vpop.eup %2319  ;;  %v1678_v45 = vmul.f32 %v2318_v42, %v2316_v20 }
 0x373   : > { %v2322_v57 = vpop.eup %2321 }
 0x374   : > { %v2324_v59 = vpop.eup %2323  ;;  %1682 = vst [vmem:[%s3166_s21 + $0x10] sm:$0xff] %v1678_v45 }
 0x375   : > { %v2326_v43 = vpop.eup %2325  ;;  %v1679_v33 = vmul.f32 %v2324_v59, %v2320_v56 }
 0x376   : > { %v1680_v58 = vmul.f32 %v2326_v43, %v2322_v57 }
 0x377   : > { %1683 = vst [vmem:[%s3166_s21 + $0x20] sm:$0xff] %v1679_v33 }
 0x378   : > { %1684 = vst [vmem:[%s3166_s21 + $0x30] sm:$0xff] %v1680_v58 }
 0x379 PF: > { %s3236_s27 = sld [smem:[#allocation16_spill]]  ;;  %s3237_s1 = sld [smem:[#allocation15_spill]] }
 0x37a   : > { %s3238_s26 = sld [smem:[#allocation17_spill]]  ;;  %s3239_s24 = smov %s2513_s25 }
 0x37f   : > { %p23_p7 = scmp.ge.s32.totalorder %s3236_s27, 4   ;;  %s3240_s25 = smov %s3237_s1 }
 0x381   :  { %25 = sbr.rel (!%p23_p7) target bundleno = 11 (0xb), region = 129 }
 0x388   :  { %1713 = vsyncpa [#allocation4], 1 }
 0x389   :  { %1715 = vsyncpa [#allocation4 + $0x1], 1 }
 0x38a   :  { %1716 = vsyncpa [#allocation6], 1 }
 0x38b   :  { %1718 = vsyncpa [#allocation6 + $0x1], 1 }
 0x38c   :  { %1719 = vsyncpa [#allocation9], 1 }
 0x38d   :  { %1721 = vsyncpa [#allocation9 + $0x1], 1 }

</bundles_post_ra>
